<compile_context>
chip_gen: v7x
topology: tpu7x:2x2x1
jax: 0.10.0
libtpu: 0.0.40
codegen_flags: <defaults>
</compile_context>

<pallas_src>
import math

import numpy as np
import jax
import jax.numpy as jnp
from jax import lax
from jax.experimental import pallas as pl
from jax.experimental.pallas import tpu as pltpu  # noqa: F401  (TPU-specific tuning hooks)


# ----------------------------- model hyper-params (small) -----------------------------
B = 2            # batch
S = 8            # sequence length
F = 16           # n_src_vocab (feature dim of image features, src_is_text=False)
D = 32           # d_model == d_word_vec
H = 4            # n_heads
DK = 8           # d_k
DV = 8           # d_v
DH = 64          # d_hidden (FFN inner)
L = 2            # n_layers
V = 24           # n_trg_vocab
N_POSITION = 200
EPS = 1e-6

BS = B * S                    # 16 folded (batch, seq) rows
NH = H * BS                   # 64 stacked (head, batch, seq) rows
CQ = H * DK                   # 32
CK = H * DK                   # 32
CV = H * DV                   # 32
CQKV = CQ + CK + CV           # 96
WIN_COLS = CQKV + D + DH      # 192  [wq|wk|wv|wo|w1]
VPAD = 128                    # lane-padded vocab width (dense output stores)

# packed "vecs" row layout (width DH = 64, narrow rows use [:, :D])
R_POS = 0                     # rows [0, BS): positional encoding, tiled over batch
R_EMB_B = BS
R_EMB_G = BS + 1
R_EMB_BETA = BS + 2
R_ENC_G = BS + 3
R_ENC_B = BS + 4
R_LAYER = BS + 5              # per layer: attn_g, attn_b, b1, b2, ffn_g, ffn_b
R_TOTAL = R_LAYER + 6 * L     # 33


# ----------------------------------- kernel helpers ------------------------------------
def _layer_norm(x, g, b, eps=EPS):
    mu = jnp.mean(x, axis=-1, keepdims=True)
    var = jnp.mean(jnp.square(x - mu), axis=-1, keepdims=True)
    return (x - mu) * lax.rsqrt(var + eps) * g + b


def transformer_kernel(x_ref, bias_ref, vecs_ref, win_ref, w2_ref,
                       embw_ref, lastw_ref, out_ref):
    f32 = jnp.float32
    bf16 = jnp.bfloat16

    pos      = vecs_ref[R_POS:R_POS + BS, :D]            # (BS, D)
    emb_b    = vecs_ref[R_EMB_B:R_EMB_B + 1, :D]
    emb_g    = vecs_ref[R_EMB_G:R_EMB_G + 1, :D]
    emb_beta = vecs_ref[R_EMB_BETA:R_EMB_BETA + 1, :D]
    enc_g    = vecs_ref[R_ENC_G:R_ENC_G + 1, :D]
    enc_b    = vecs_ref[R_ENC_B:R_ENC_B + 1, :D]

    # --- src_word_emb: Linear -> ReLU -> LayerNorm (bf16 MXU operands, f32 accumulate) ---
    x = x_ref[...]                                        # (BS, F)
    h = jnp.dot(x.astype(bf16), embw_ref[...].astype(bf16),
                preferred_element_type=f32) + emb_b
    h = jnp.maximum(h, 0.0)
    h = _layer_norm(h, emb_g, emb_beta)

    # --- positional encoding (dropout = identity in eval) + encoder input LayerNorm ---
    h = h + pos
    h = _layer_norm(h, enc_g, enc_b)

    # additive attention bias: 0 inside each (head, batch) block on valid keys, -1e9 else
    bias = bias_ref[...]                                  # (NH, NH) f32

    for l in range(L):
        r0 = R_LAYER + 6 * l
        attn_g = vecs_ref[r0 + 0:r0 + 1, :D]
        attn_b = vecs_ref[r0 + 1:r0 + 2, :D]
        b1     = vecs_ref[r0 + 2:r0 + 3, :]               # (1, DH)
        b2     = vecs_ref[r0 + 3:r0 + 4, :D]
        ffn_g  = vecs_ref[r0 + 4:r0 + 5, :D]
        ffn_b  = vecs_ref[r0 + 5:r0 + 6, :D]

        w_l = win_ref[l]                                  # (D, 192) f32 = [wq|wk|wv|wo|w1]
        w_qkv = w_l[:, :CQKV].astype(bf16)                # (D, 96)  (wq pre-scaled by 1/sqrt(dk))
        w_o   = w_l[:, CQKV:CQKV + D].astype(bf16)        # (D, D)
        w_1   = w_l[:, CQKV + D:].astype(bf16)            # (D, DH)

        # ---------------- multi-head self-attention (post-LN residual) ----------------
        residual = h
        qkv = jnp.dot(h.astype(bf16), w_qkv, preferred_element_type=f32)   # (BS, 96)

        # stack heads along sublanes -> rows ordered (head, batch, seq)
        q_st = jnp.concatenate(
            [qkv[:, hh * DK:(hh + 1) * DK] for hh in range(H)], axis=0)             # (NH, DK)
        k_st = jnp.concatenate(
            [qkv[:, CQ + hh * DK:CQ + (hh + 1) * DK] for hh in range(H)], axis=0)   # (NH, DK)
        v_st = jnp.concatenate(
            [qkv[:, CQ + CK + hh * DV:CQ + CK + (hh + 1) * DV] for hh in range(H)],
            axis=0)                                                                  # (NH, DV)

        scores = lax.dot_general(q_st.astype(bf16), k_st.astype(bf16),
                                 (((1,), (1,)), ((), ())),
                                 preferred_element_type=f32)                         # (NH, NH)
        scores = scores + bias
        m = jnp.max(scores, axis=-1, keepdims=True)
        e = jnp.exp(scores - m)
        attn = e * pl.reciprocal(jnp.sum(e, axis=-1, keepdims=True), approx=True)
        ctx = jnp.dot(attn.astype(bf16), v_st.astype(bf16),
                      preferred_element_type=f32)                                    # (NH, DV)

        # unstack heads back to lanes: (BS, H*DV)
        o = jnp.concatenate([ctx[hh * BS:(hh + 1) * BS, :] for hh in range(H)], axis=1)

        h = jnp.dot(o.astype(bf16), w_o, preferred_element_type=f32) + residual
        h = _layer_norm(h, attn_g, attn_b)

        # ---------------- position-wise feed forward (post-LN residual) ----------------
        residual = h
        t = jnp.maximum(
            jnp.dot(h.astype(bf16), w_1, preferred_element_type=f32) + b1, 0.0)
        h = jnp.dot(t.astype(bf16), w2_ref[l].astype(bf16),
                    preferred_element_type=f32) + b2 + residual
        h = _layer_norm(h, ffn_g, ffn_b)

    # --- last_prj: Linear(D -> V, bias=False); weight lane-padded to VPAD (dense store) ---
    out_ref[...] = jnp.dot(h.astype(bf16), lastw_ref[...].astype(bf16),
                           preferred_element_type=f32)


# ------------------------------------ host wrapper --------------------------------------
def pack_params(params):
    """One-time host-side packing of the many small parameter tensors into 5 arrays."""
    def row(v):
        r = np.zeros((1, DH), np.float32)
        v = np.asarray(v, np.float32).reshape(-1)
        r[0, :v.shape[0]] = v
        return r

    pos_bsd = np.tile(np.asarray(params["pos_table"][:S], np.float32), (B, 1))  # (BS, D)
    rows = [np.pad(pos_bsd, ((0, 0), (0, DH - D)))]
    for name in ("emb_b", "emb_g", "emb_beta", "enc_g", "enc_b"):
        rows.append(row(params[name]))
    for l in range(L):
        rows += [row(params["attn_g"][l]), row(params["attn_b"][l]),
                 row(params["b1"][l]), row(params["b2"][l]),
                 row(params["ffn_g"][l]), row(params["ffn_b"][l])]
    vecs = np.concatenate(rows, axis=0)
    assert vecs.shape == (R_TOTAL, DH), vecs.shape

    inv_temp = 1.0 / math.sqrt(DK)
    w_in = jnp.concatenate([params["wq"] * inv_temp, params["wk"], params["wv"],
                            params["wo"], params["w1"]], axis=-1)        # (L, D, 192)
    last_w_pad = jnp.zeros((D, VPAD), jnp.float32).at[:, :V].set(params["last_w"])
    return {"vecs": jnp.asarray(vecs), "w_in": w_in, "w2": params["w2"],
            "emb_w": params["emb_w"], "last_w_pad": last_w_pad}


@jax.jit
def transformer_forward(src_seq, packed):
    b, s, f = src_seq.shape
    x2d = src_seq.reshape(b * s, f)

    # get_pad_mask_img: key j of batch b is valid iff src_seq[b, j, 0] != 0.
    valid = (src_seq[:, :, 0] != 0.0).reshape(-1)           # (B*S,) ordered (b, j)
    key_valid = jnp.tile(valid, (H,))                       # (NH,)   ordered (h, b, j)
    gid = jnp.arange(NH) // s                               # (head, batch) group id per row
    ok = (gid[:, None] == gid[None, :]) & key_valid[None, :]
    bias = jnp.where(ok, 0.0, -1e9).astype(jnp.float32)     # (NH, NH) additive mask

    # Single grid-less call: batch folded into sublanes; everything resident in VMEM.
    out2d = pl.pallas_call(
        transformer_kernel,
        out_shape=jax.ShapeDtypeStruct((b * s, VPAD), jnp.float32),
    )(x2d, bias, packed["vecs"], packed["w_in"], packed["w2"],
      packed["emb_w"], packed["last_w_pad"])

    return out2d[:, :V].reshape(b, s, V)


# ------------------------------- deterministic param init -------------------------------
def _xavier(key, shape):
    fan_in, fan_out = shape[-2], shape[-1]
    limit = math.sqrt(6.0 / (fan_in + fan_out))
    return jax.random.uniform(key, shape, jnp.float32, -limit, limit)


def _sinusoid_table(n_position, d_hid):
    pos = np.arange(n_position, dtype=np.float64)[:, None]
    j = np.arange(d_hid, dtype=np.float64)[None, :]
    angle = pos / np.power(10000.0, 2.0 * (np.floor(j / 2.0)) / d_hid)
    table = np.zeros((n_position, d_hid), dtype=np.float64)
    table[:, 0::2] = np.sin(angle[:, 0::2])
    table[:, 1::2] = np.cos(angle[:, 1::2])
    return jnp.asarray(table, dtype=jnp.float32)


def init_params(key):
    ks = jax.random.split(key, 8)
    return {
        "pos_table": _sinusoid_table(N_POSITION, D),
        "emb_w": _xavier(ks[0], (F, D)),
        "emb_b": jnp.zeros((1, D), jnp.float32),
        "emb_g": jnp.ones((1, D), jnp.float32),
        "emb_beta": jnp.zeros((1, D), jnp.float32),
        "enc_g": jnp.ones((1, D), jnp.float32),
        "enc_b": jnp.zeros((1, D), jnp.float32),
        "wq": _xavier(ks[1], (L, D, H * DK)),
        "wk": _xavier(ks[2], (L, D, H * DK)),
        "wv": _xavier(ks[3], (L, D, H * DV)),
        "wo": _xavier(ks[4], (L, H * DV, D)),
        "attn_g": jnp.ones((L, D), jnp.float32),
        "attn_b": jnp.zeros((L, D), jnp.float32),
        "w1": _xavier(ks[5], (L, D, DH)),
        "b1": jnp.zeros((L, DH), jnp.float32),
        "w2": _xavier(ks[6], (L, DH, D)),
        "b2": jnp.zeros((L, D), jnp.float32),
        "ffn_g": jnp.ones((L, D), jnp.float32),
        "ffn_b": jnp.zeros((L, D), jnp.float32),
        "last_w": _xavier(ks[7], (D, V)),
    }


# ------------------------------------ pure-JAX reference --------------------------------
def reference_forward(src_seq, params):
    mask = (src_seq[..., 0:1] != 0.0).astype(jnp.float32)       # (B, S, 1)
    mask = jnp.transpose(mask, (0, 2, 1))[:, None, :, :]        # (B, 1, 1, S)
    h = jnp.maximum(src_seq @ params["emb_w"] + params["emb_b"], 0.0)
    h = _layer_norm(h, params["emb_g"], params["emb_beta"])
    h = h + params["pos_table"][: src_seq.shape[1]][None]
    h = _layer_norm(h, params["enc_g"], params["enc_b"])
    for l in range(L):
        residual = h
        q = (h @ params["wq"][l]).reshape(B, S, H, DK).transpose(0, 2, 1, 3)
        k = (h @ params["wk"][l]).reshape(B, S, H, DK).transpose(0, 2, 1, 3)
        v = (h @ params["wv"][l]).reshape(B, S, H, DV).transpose(0, 2, 1, 3)
        scores = jnp.einsum("bhqd,bhkd->bhqk", q, k) / math.sqrt(DK)
        scores = jnp.where(mask == 0.0, -1e9, scores)
        attn = jax.nn.softmax(scores, axis=-1)
        o = jnp.einsum("bhqk,bhkd->bhqd", attn, v).transpose(0, 2, 1, 3).reshape(B, S, H * DV)
        h = o @ params["wo"][l] + residual
        h = _layer_norm(h, params["attn_g"][l], params["attn_b"][l])
        residual = h
        t = jnp.maximum(h @ params["w1"][l] + params["b1"][l], 0.0)
        h = t @ params["w2"][l] + params["b2"][l] + residual
        h = _layer_norm(h, params["ffn_g"][l], params["ffn_b"][l])
    return h @ params["last_w"]


# --------------------------------------- main -------------------------------------------
if __name__ == "__main__":
    key = jax.random.PRNGKey(0)
    k_param, k_src = jax.random.split(key)
    params = init_params(k_param)
    packed = pack_params(params)

    src_seq = jax.random.normal(k_src, (B, S, F), dtype=jnp.float32)
    # make the last sequence position a "pad" row so the attention mask is exercised
    src_seq = src_seq.at[:, -1, :].set(0.0)
    trg_seq = jnp.zeros((B, S), dtype=jnp.int32)  # unused by forward (encoder-only)

    out = jax.block_until_ready(transformer_forward(src_seq, packed))

    assert out.shape == (B, S, V), out.shape
    assert bool(jnp.all(jnp.isfinite(out)))

    ref = jax.block_until_ready(reference_forward(src_seq, params))
    # bf16 MXU operands (f32 accumulation) in the kernel vs f32 reference -> loose tolerance
    np.testing.assert_allclose(np.asarray(out), np.asarray(ref), rtol=4e-2, atol=4e-2)

    print("KERNEL_OK")
</pallas_src>

<mosaic_0001>
module attributes {stable_mosaic.version = 11 : i64} {
  func.func @transformer_kernel(%arg0: memref<16x16xf32, #tpu.memory_space<vmem>>, %arg1: memref<64x64xf32, #tpu.memory_space<vmem>>, %arg2: memref<33x64xf32, #tpu.memory_space<vmem>>, %arg3: memref<2x32x192xf32, #tpu.memory_space<vmem>>, %arg4: memref<2x64x32xf32, #tpu.memory_space<vmem>>, %arg5: memref<16x32xf32, #tpu.memory_space<vmem>>, %arg6: memref<32x128xf32, #tpu.memory_space<vmem>>, %arg7: memref<16x128xf32, #tpu.memory_space<vmem>>) attributes {dimension_semantics = [], scalar_prefetch = 0 : i64, scratch_operands = 0 : i64, tpu.core_type = #tpu.core_type<tc>} {
    %c0 = arith.constant 0 : index
    %c0_0 = arith.constant 0 : index
    %0 = vector.load %arg2[%c0, %c0_0] : memref<33x64xf32, #tpu.memory_space<vmem>>, vector<16x32xf32>
    %c16 = arith.constant 16 : index
    %c0_1 = arith.constant 0 : index
    %1 = vector.load %arg2[%c16, %c0_1] : memref<33x64xf32, #tpu.memory_space<vmem>>, vector<1x32xf32>
    %c17 = arith.constant 17 : index
    %c0_2 = arith.constant 0 : index
    %2 = vector.load %arg2[%c17, %c0_2] : memref<33x64xf32, #tpu.memory_space<vmem>>, vector<1x32xf32>
    %c18 = arith.constant 18 : index
    %c0_3 = arith.constant 0 : index
    %3 = vector.load %arg2[%c18, %c0_3] : memref<33x64xf32, #tpu.memory_space<vmem>>, vector<1x32xf32>
    %c19 = arith.constant 19 : index
    %c0_4 = arith.constant 0 : index
    %4 = vector.load %arg2[%c19, %c0_4] : memref<33x64xf32, #tpu.memory_space<vmem>>, vector<1x32xf32>
    %c20 = arith.constant 20 : index
    %c0_5 = arith.constant 0 : index
    %5 = vector.load %arg2[%c20, %c0_5] : memref<33x64xf32, #tpu.memory_space<vmem>>, vector<1x32xf32>
    %c0_6 = arith.constant 0 : index
    %c0_7 = arith.constant 0 : index
    %6 = vector.load %arg0[%c0_6, %c0_7] : memref<16x16xf32, #tpu.memory_space<vmem>>, vector<16x16xf32>
    %7 = arith.truncf %6 : vector<16x16xf32> to vector<16x16xbf16>
    %c0_8 = arith.constant 0 : index
    %c0_9 = arith.constant 0 : index
    %8 = vector.load %arg5[%c0_8, %c0_9] : memref<16x32xf32, #tpu.memory_space<vmem>>, vector<16x32xf32>
    %9 = arith.truncf %8 : vector<16x32xf32> to vector<16x32xbf16>
    %cst = arith.constant dense<0.000000e+00> : vector<16x32xf32>
    %10 = tpu.matmul %7, %9, %cst {dimension_numbers = #tpu.dot_dimension_numbers<[1], [0], [0], [1], [0, 0, 1, 1], [], []>} : vector<16x16xbf16>, vector<16x32xbf16>, vector<16x32xf32> -> vector<16x32xf32>
    %11 = vector.broadcast %1 : vector<1x32xf32> to vector<16x32xf32>
    %12 = arith.addf %10, %11 : vector<16x32xf32>
    %cst_10 = arith.constant 0.000000e+00 : f32
    %13 = vector.broadcast %cst_10 : f32 to vector<16x32xf32>
    %14 = arith.maximumf %12, %13 : vector<16x32xf32>
    %cst_11 = arith.constant dense<0.000000e+00> : vector<16xf32>
    %15 = vector.multi_reduction <add>, %14, %cst_11 [1] : vector<16x32xf32> to vector<16xf32>
    %16 = vector.shape_cast %15 : vector<16xf32> to vector<16x1xf32>
    %cst_12 = arith.constant 3.200000e+01 : f32
    %17 = vector.broadcast %cst_12 : f32 to vector<16x1xf32>
    %18 = arith.divf %16, %17 : vector<16x1xf32>
    %19 = vector.broadcast %18 : vector<16x1xf32> to vector<16x32xf32>
    %20 = arith.subf %14, %19 : vector<16x32xf32>
    %21 = arith.mulf %20, %20 : vector<16x32xf32>
    %cst_13 = arith.constant dense<0.000000e+00> : vector<16xf32>
    %22 = vector.multi_reduction <add>, %21, %cst_13 [1] : vector<16x32xf32> to vector<16xf32>
    %23 = vector.shape_cast %22 : vector<16xf32> to vector<16x1xf32>
    %cst_14 = arith.constant 3.200000e+01 : f32
    %24 = vector.broadcast %cst_14 : f32 to vector<16x1xf32>
    %25 = arith.divf %23, %24 : vector<16x1xf32>
    %26 = vector.broadcast %18 : vector<16x1xf32> to vector<16x32xf32>
    %27 = arith.subf %14, %26 : vector<16x32xf32>
    %cst_15 = arith.constant 9.99999997E-7 : f32
    %28 = vector.broadcast %cst_15 : f32 to vector<16x1xf32>
    %29 = arith.addf %25, %28 : vector<16x1xf32>
    %30 = math.rsqrt %29 : vector<16x1xf32>
    %31 = vector.broadcast %30 : vector<16x1xf32> to vector<16x32xf32>
    %32 = arith.mulf %27, %31 : vector<16x32xf32>
    %33 = vector.broadcast %2 : vector<1x32xf32> to vector<16x32xf32>
    %34 = arith.mulf %32, %33 : vector<16x32xf32>
    %35 = vector.broadcast %3 : vector<1x32xf32> to vector<16x32xf32>
    %36 = arith.addf %34, %35 : vector<16x32xf32>
    %37 = arith.addf %36, %0 : vector<16x32xf32>
    %cst_16 = arith.constant dense<0.000000e+00> : vector<16xf32>
    %38 = vector.multi_reduction <add>, %37, %cst_16 [1] : vector<16x32xf32> to vector<16xf32>
    %39 = vector.shape_cast %38 : vector<16xf32> to vector<16x1xf32>
    %cst_17 = arith.constant 3.200000e+01 : f32
    %40 = vector.broadcast %cst_17 : f32 to vector<16x1xf32>
    %41 = arith.divf %39, %40 : vector<16x1xf32>
    %42 = vector.broadcast %41 : vector<16x1xf32> to vector<16x32xf32>
    %43 = arith.subf %37, %42 : vector<16x32xf32>
    %44 = arith.mulf %43, %43 : vector<16x32xf32>
    %cst_18 = arith.constant dense<0.000000e+00> : vector<16xf32>
    %45 = vector.multi_reduction <add>, %44, %cst_18 [1] : vector<16x32xf32> to vector<16xf32>
    %46 = vector.shape_cast %45 : vector<16xf32> to vector<16x1xf32>
    %cst_19 = arith.constant 3.200000e+01 : f32
    %47 = vector.broadcast %cst_19 : f32 to vector<16x1xf32>
    %48 = arith.divf %46, %47 : vector<16x1xf32>
    %49 = vector.broadcast %41 : vector<16x1xf32> to vector<16x32xf32>
    %50 = arith.subf %37, %49 : vector<16x32xf32>
    %cst_20 = arith.constant 9.99999997E-7 : f32
    %51 = vector.broadcast %cst_20 : f32 to vector<16x1xf32>
    %52 = arith.addf %48, %51 : vector<16x1xf32>
    %53 = math.rsqrt %52 : vector<16x1xf32>
    %54 = vector.broadcast %53 : vector<16x1xf32> to vector<16x32xf32>
    %55 = arith.mulf %50, %54 : vector<16x32xf32>
    %56 = vector.broadcast %4 : vector<1x32xf32> to vector<16x32xf32>
    %57 = arith.mulf %55, %56 : vector<16x32xf32>
    %58 = vector.broadcast %5 : vector<1x32xf32> to vector<16x32xf32>
    %59 = arith.addf %57, %58 : vector<16x32xf32>
    %c0_21 = arith.constant 0 : index
    %c0_22 = arith.constant 0 : index
    %60 = vector.load %arg1[%c0_21, %c0_22] : memref<64x64xf32, #tpu.memory_space<vmem>>, vector<64x64xf32>
    %c21 = arith.constant 21 : index
    %c0_23 = arith.constant 0 : index
    %61 = vector.load %arg2[%c21, %c0_23] : memref<33x64xf32, #tpu.memory_space<vmem>>, vector<1x32xf32>
    %c22 = arith.constant 22 : index
    %c0_24 = arith.constant 0 : index
    %62 = vector.load %arg2[%c22, %c0_24] : memref<33x64xf32, #tpu.memory_space<vmem>>, vector<1x32xf32>
    %c23 = arith.constant 23 : index
    %c0_25 = arith.constant 0 : index
    %63 = vector.load %arg2[%c23, %c0_25] : memref<33x64xf32, #tpu.memory_space<vmem>>, vector<1x64xf32>
    %c24 = arith.constant 24 : index
    %c0_26 = arith.constant 0 : index
    %64 = vector.load %arg2[%c24, %c0_26] : memref<33x64xf32, #tpu.memory_space<vmem>>, vector<1x32xf32>
    %c25 = arith.constant 25 : index
    %c0_27 = arith.constant 0 : index
    %65 = vector.load %arg2[%c25, %c0_27] : memref<33x64xf32, #tpu.memory_space<vmem>>, vector<1x32xf32>
    %c26 = arith.constant 26 : index
    %c0_28 = arith.constant 0 : index
    %66 = vector.load %arg2[%c26, %c0_28] : memref<33x64xf32, #tpu.memory_space<vmem>>, vector<1x32xf32>
    %c0_29 = arith.constant 0 : index
    %c0_30 = arith.constant 0 : index
    %c0_31 = arith.constant 0 : index
    %67 = vector.load %arg3[%c0_29, %c0_30, %c0_31] : memref<2x32x192xf32, #tpu.memory_space<vmem>>, vector<1x32x192xf32>
    %68 = vector.shape_cast %67 : vector<1x32x192xf32> to vector<32x192xf32>
    %69 = vector.extract_strided_slice %68 {offsets = [0, 0], sizes = [32, 96], strides = [1, 1]} : vector<32x192xf32> to vector<32x96xf32>
    %70 = arith.truncf %69 : vector<32x96xf32> to vector<32x96xbf16>
    %71 = vector.extract_strided_slice %68 {offsets = [0, 96], sizes = [32, 32], strides = [1, 1]} : vector<32x192xf32> to vector<32x32xf32>
    %72 = arith.truncf %71 : vector<32x32xf32> to vector<32x32xbf16>
    %73 = vector.extract_strided_slice %68 {offsets = [0, 128], sizes = [32, 64], strides = [1, 1]} : vector<32x192xf32> to vector<32x64xf32>
    %74 = arith.truncf %73 : vector<32x64xf32> to vector<32x64xbf16>
    %75 = arith.truncf %59 : vector<16x32xf32> to vector<16x32xbf16>
    %cst_32 = arith.constant dense<0.000000e+00> : vector<16x96xf32>
    %76 = tpu.matmul %75, %70, %cst_32 {dimension_numbers = #tpu.dot_dimension_numbers<[1], [0], [0], [1], [0, 0, 1, 1], [], []>} : vector<16x32xbf16>, vector<32x96xbf16>, vector<16x96xf32> -> vector<16x96xf32>
    %77 = vector.extract_strided_slice %76 {offsets = [0, 0], sizes = [16, 8], strides = [1, 1]} : vector<16x96xf32> to vector<16x8xf32>
    %78 = vector.extract_strided_slice %76 {offsets = [0, 8], sizes = [16, 8], strides = [1, 1]} : vector<16x96xf32> to vector<16x8xf32>
    %79 = vector.extract_strided_slice %76 {offsets = [0, 16], sizes = [16, 8], strides = [1, 1]} : vector<16x96xf32> to vector<16x8xf32>
    %80 = vector.extract_strided_slice %76 {offsets = [0, 24], sizes = [16, 8], strides = [1, 1]} : vector<16x96xf32> to vector<16x8xf32>
    %81 = tpu.concatenate %77, %78, %79, %80 in 0 : vector<16x8xf32>, vector<16x8xf32>, vector<16x8xf32>, vector<16x8xf32> -> vector<64x8xf32>
    %82 = vector.extract_strided_slice %76 {offsets = [0, 32], sizes = [16, 8], strides = [1, 1]} : vector<16x96xf32> to vector<16x8xf32>
    %83 = vector.extract_strided_slice %76 {offsets = [0, 40], sizes = [16, 8], strides = [1, 1]} : vector<16x96xf32> to vector<16x8xf32>
    %84 = vector.extract_strided_slice %76 {offsets = [0, 48], sizes = [16, 8], strides = [1, 1]} : vector<16x96xf32> to vector<16x8xf32>
    %85 = vector.extract_strided_slice %76 {offsets = [0, 56], sizes = [16, 8], strides = [1, 1]} : vector<16x96xf32> to vector<16x8xf32>
    %86 = tpu.concatenate %82, %83, %84, %85 in 0 : vector<16x8xf32>, vector<16x8xf32>, vector<16x8xf32>, vector<16x8xf32> -> vector<64x8xf32>
    %87 = vector.extract_strided_slice %76 {offsets = [0, 64], sizes = [16, 8], strides = [1, 1]} : vector<16x96xf32> to vector<16x8xf32>
    %88 = vector.extract_strided_slice %76 {offsets = [0, 72], sizes = [16, 8], strides = [1, 1]} : vector<16x96xf32> to vector<16x8xf32>
    %89 = vector.extract_strided_slice %76 {offsets = [0, 80], sizes = [16, 8], strides = [1, 1]} : vector<16x96xf32> to vector<16x8xf32>
    %90 = vector.extract_strided_slice %76 {offsets = [0, 88], sizes = [16, 8], strides = [1, 1]} : vector<16x96xf32> to vector<16x8xf32>
    %91 = tpu.concatenate %87, %88, %89, %90 in 0 : vector<16x8xf32>, vector<16x8xf32>, vector<16x8xf32>, vector<16x8xf32> -> vector<64x8xf32>
    %92 = arith.truncf %81 : vector<64x8xf32> to vector<64x8xbf16>
    %93 = arith.truncf %86 : vector<64x8xf32> to vector<64x8xbf16>
    %cst_33 = arith.constant dense<0.000000e+00> : vector<64x64xf32>
    %94 = tpu.matmul %92, %93, %cst_33 {dimension_numbers = #tpu.dot_dimension_numbers<[1], [1], [0], [0], [0, 0, 1, 0], [], []>} : vector<64x8xbf16>, vector<64x8xbf16>, vector<64x64xf32> -> vector<64x64xf32>
    %95 = arith.addf %94, %60 : vector<64x64xf32>
    %cst_34 = arith.constant dense<0xFF800000> : vector<64xf32>
    %96 = vector.multi_reduction <maximumf>, %95, %cst_34 [1] : vector<64x64xf32> to vector<64xf32>
    %97 = vector.shape_cast %96 : vector<64xf32> to vector<64x1xf32>
    %98 = vector.broadcast %97 : vector<64x1xf32> to vector<64x64xf32>
    %99 = arith.subf %95, %98 : vector<64x64xf32>
    %100 = math.exp %99 : vector<64x64xf32>
    %cst_35 = arith.constant dense<0.000000e+00> : vector<64xf32>
    %101 = vector.multi_reduction <add>, %100, %cst_35 [1] : vector<64x64xf32> to vector<64xf32>
    %102 = vector.shape_cast %101 : vector<64xf32> to vector<64x1xf32>
    %103 = tpu.reciprocal %102 {approx = true} : vector<64x1xf32> -> vector<64x1xf32>
    %104 = vector.broadcast %103 : vector<64x1xf32> to vector<64x64xf32>
    %105 = arith.mulf %100, %104 : vector<64x64xf32>
    %106 = arith.truncf %105 : vector<64x64xf32> to vector<64x64xbf16>
    %107 = arith.truncf %91 : vector<64x8xf32> to vector<64x8xbf16>
    %cst_36 = arith.constant dense<0.000000e+00> : vector<64x8xf32>
    %108 = tpu.matmul %106, %107, %cst_36 {dimension_numbers = #tpu.dot_dimension_numbers<[1], [0], [0], [1], [0, 0, 1, 1], [], []>} : vector<64x64xbf16>, vector<64x8xbf16>, vector<64x8xf32> -> vector<64x8xf32>
    %109 = vector.extract_strided_slice %108 {offsets = [0, 0], sizes = [16, 8], strides = [1, 1]} : vector<64x8xf32> to vector<16x8xf32>
    %110 = vector.extract_strided_slice %108 {offsets = [16, 0], sizes = [16, 8], strides = [1, 1]} : vector<64x8xf32> to vector<16x8xf32>
    %111 = vector.extract_strided_slice %108 {offsets = [32, 0], sizes = [16, 8], strides = [1, 1]} : vector<64x8xf32> to vector<16x8xf32>
    %112 = vector.extract_strided_slice %108 {offsets = [48, 0], sizes = [16, 8], strides = [1, 1]} : vector<64x8xf32> to vector<16x8xf32>
    %113 = tpu.concatenate %109, %110, %111, %112 in 1 : vector<16x8xf32>, vector<16x8xf32>, vector<16x8xf32>, vector<16x8xf32> -> vector<16x32xf32>
    %114 = arith.truncf %113 : vector<16x32xf32> to vector<16x32xbf16>
    %cst_37 = arith.constant dense<0.000000e+00> : vector<16x32xf32>
    %115 = tpu.matmul %114, %72, %cst_37 {dimension_numbers = #tpu.dot_dimension_numbers<[1], [0], [0], [1], [0, 0, 1, 1], [], []>} : vector<16x32xbf16>, vector<32x32xbf16>, vector<16x32xf32> -> vector<16x32xf32>
    %116 = arith.addf %115, %59 : vector<16x32xf32>
    %cst_38 = arith.constant dense<0.000000e+00> : vector<16xf32>
    %117 = vector.multi_reduction <add>, %116, %cst_38 [1] : vector<16x32xf32> to vector<16xf32>
    %118 = vector.shape_cast %117 : vector<16xf32> to vector<16x1xf32>
    %cst_39 = arith.constant 3.200000e+01 : f32
    %119 = vector.broadcast %cst_39 : f32 to vector<16x1xf32>
    %120 = arith.divf %118, %119 : vector<16x1xf32>
    %121 = vector.broadcast %120 : vector<16x1xf32> to vector<16x32xf32>
    %122 = arith.subf %116, %121 : vector<16x32xf32>
    %123 = arith.mulf %122, %122 : vector<16x32xf32>
    %cst_40 = arith.constant dense<0.000000e+00> : vector<16xf32>
    %124 = vector.multi_reduction <add>, %123, %cst_40 [1] : vector<16x32xf32> to vector<16xf32>
    %125 = vector.shape_cast %124 : vector<16xf32> to vector<16x1xf32>
    %cst_41 = arith.constant 3.200000e+01 : f32
    %126 = vector.broadcast %cst_41 : f32 to vector<16x1xf32>
    %127 = arith.divf %125, %126 : vector<16x1xf32>
    %128 = vector.broadcast %120 : vector<16x1xf32> to vector<16x32xf32>
    %129 = arith.subf %116, %128 : vector<16x32xf32>
    %cst_42 = arith.constant 9.99999997E-7 : f32
    %130 = vector.broadcast %cst_42 : f32 to vector<16x1xf32>
    %131 = arith.addf %127, %130 : vector<16x1xf32>
    %132 = math.rsqrt %131 : vector<16x1xf32>
    %133 = vector.broadcast %132 : vector<16x1xf32> to vector<16x32xf32>
    %134 = arith.mulf %129, %133 : vector<16x32xf32>
    %135 = vector.broadcast %61 : vector<1x32xf32> to vector<16x32xf32>
    %136 = arith.mulf %134, %135 : vector<16x32xf32>
    %137 = vector.broadcast %62 : vector<1x32xf32> to vector<16x32xf32>
    %138 = arith.addf %136, %137 : vector<16x32xf32>
    %139 = arith.truncf %138 : vector<16x32xf32> to vector<16x32xbf16>
    %cst_43 = arith.constant dense<0.000000e+00> : vector<16x64xf32>
    %140 = tpu.matmul %139, %74, %cst_43 {dimension_numbers = #tpu.dot_dimension_numbers<[1], [0], [0], [1], [0, 0, 1, 1], [], []>} : vector<16x32xbf16>, vector<32x64xbf16>, vector<16x64xf32> -> vector<16x64xf32>
    %141 = vector.broadcast %63 : vector<1x64xf32> to vector<16x64xf32>
    %142 = arith.addf %140, %141 : vector<16x64xf32>
    %cst_44 = arith.constant 0.000000e+00 : f32
    %143 = vector.broadcast %cst_44 : f32 to vector<16x64xf32>
    %144 = arith.maximumf %142, %143 : vector<16x64xf32>
    %145 = arith.truncf %144 : vector<16x64xf32> to vector<16x64xbf16>
    %c0_45 = arith.constant 0 : index
    %c0_46 = arith.constant 0 : index
    %c0_47 = arith.constant 0 : index
    %146 = vector.load %arg4[%c0_45, %c0_46, %c0_47] : memref<2x64x32xf32, #tpu.memory_space<vmem>>, vector<1x64x32xf32>
    %147 = vector.shape_cast %146 : vector<1x64x32xf32> to vector<64x32xf32>
    %148 = arith.truncf %147 : vector<64x32xf32> to vector<64x32xbf16>
    %cst_48 = arith.constant dense<0.000000e+00> : vector<16x32xf32>
    %149 = tpu.matmul %145, %148, %cst_48 {dimension_numbers = #tpu.dot_dimension_numbers<[1], [0], [0], [1], [0, 0, 1, 1], [], []>} : vector<16x64xbf16>, vector<64x32xbf16>, vector<16x32xf32> -> vector<16x32xf32>
    %150 = vector.broadcast %64 : vector<1x32xf32> to vector<16x32xf32>
    %151 = arith.addf %149, %150 : vector<16x32xf32>
    %152 = arith.addf %151, %138 : vector<16x32xf32>
    %cst_49 = arith.constant dense<0.000000e+00> : vector<16xf32>
    %153 = vector.multi_reduction <add>, %152, %cst_49 [1] : vector<16x32xf32> to vector<16xf32>
    %154 = vector.shape_cast %153 : vector<16xf32> to vector<16x1xf32>
    %cst_50 = arith.constant 3.200000e+01 : f32
    %155 = vector.broadcast %cst_50 : f32 to vector<16x1xf32>
    %156 = arith.divf %154, %155 : vector<16x1xf32>
    %157 = vector.broadcast %156 : vector<16x1xf32> to vector<16x32xf32>
    %158 = arith.subf %152, %157 : vector<16x32xf32>
    %159 = arith.mulf %158, %158 : vector<16x32xf32>
    %cst_51 = arith.constant dense<0.000000e+00> : vector<16xf32>
    %160 = vector.multi_reduction <add>, %159, %cst_51 [1] : vector<16x32xf32> to vector<16xf32>
    %161 = vector.shape_cast %160 : vector<16xf32> to vector<16x1xf32>
    %cst_52 = arith.constant 3.200000e+01 : f32
    %162 = vector.broadcast %cst_52 : f32 to vector<16x1xf32>
    %163 = arith.divf %161, %162 : vector<16x1xf32>
    %164 = vector.broadcast %156 : vector<16x1xf32> to vector<16x32xf32>
    %165 = arith.subf %152, %164 : vector<16x32xf32>
    %cst_53 = arith.constant 9.99999997E-7 : f32
    %166 = vector.broadcast %cst_53 : f32 to vector<16x1xf32>
    %167 = arith.addf %163, %166 : vector<16x1xf32>
    %168 = math.rsqrt %167 : vector<16x1xf32>
    %169 = vector.broadcast %168 : vector<16x1xf32> to vector<16x32xf32>
    %170 = arith.mulf %165, %169 : vector<16x32xf32>
    %171 = vector.broadcast %65 : vector<1x32xf32> to vector<16x32xf32>
    %172 = arith.mulf %170, %171 : vector<16x32xf32>
    %173 = vector.broadcast %66 : vector<1x32xf32> to vector<16x32xf32>
    %174 = arith.addf %172, %173 : vector<16x32xf32>
    %c27 = arith.constant 27 : index
    %c0_54 = arith.constant 0 : index
    %175 = vector.load %arg2[%c27, %c0_54] : memref<33x64xf32, #tpu.memory_space<vmem>>, vector<1x32xf32>
    %c28 = arith.constant 28 : index
    %c0_55 = arith.constant 0 : index
    %176 = vector.load %arg2[%c28, %c0_55] : memref<33x64xf32, #tpu.memory_space<vmem>>, vector<1x32xf32>
    %c29 = arith.constant 29 : index
    %c0_56 = arith.constant 0 : index
    %177 = vector.load %arg2[%c29, %c0_56] : memref<33x64xf32, #tpu.memory_space<vmem>>, vector<1x64xf32>
    %c30 = arith.constant 30 : index
    %c0_57 = arith.constant 0 : index
    %178 = vector.load %arg2[%c30, %c0_57] : memref<33x64xf32, #tpu.memory_space<vmem>>, vector<1x32xf32>
    %c31 = arith.constant 31 : index
    %c0_58 = arith.constant 0 : index
    %179 = vector.load %arg2[%c31, %c0_58] : memref<33x64xf32, #tpu.memory_space<vmem>>, vector<1x32xf32>
    %c32 = arith.constant 32 : index
    %c0_59 = arith.constant 0 : index
    %180 = vector.load %arg2[%c32, %c0_59] : memref<33x64xf32, #tpu.memory_space<vmem>>, vector<1x32xf32>
    %c1 = arith.constant 1 : index
    %c0_60 = arith.constant 0 : index
    %c0_61 = arith.constant 0 : index
    %181 = vector.load %arg3[%c1, %c0_60, %c0_61] : memref<2x32x192xf32, #tpu.memory_space<vmem>>, vector<1x32x192xf32>
    %182 = vector.shape_cast %181 : vector<1x32x192xf32> to vector<32x192xf32>
    %183 = vector.extract_strided_slice %182 {offsets = [0, 0], sizes = [32, 96], strides = [1, 1]} : vector<32x192xf32> to vector<32x96xf32>
    %184 = arith.truncf %183 : vector<32x96xf32> to vector<32x96xbf16>
    %185 = vector.extract_strided_slice %182 {offsets = [0, 96], sizes = [32, 32], strides = [1, 1]} : vector<32x192xf32> to vector<32x32xf32>
    %186 = arith.truncf %185 : vector<32x32xf32> to vector<32x32xbf16>
    %187 = vector.extract_strided_slice %182 {offsets = [0, 128], sizes = [32, 64], strides = [1, 1]} : vector<32x192xf32> to vector<32x64xf32>
    %188 = arith.truncf %187 : vector<32x64xf32> to vector<32x64xbf16>
    %189 = arith.truncf %174 : vector<16x32xf32> to vector<16x32xbf16>
    %cst_62 = arith.constant dense<0.000000e+00> : vector<16x96xf32>
    %190 = tpu.matmul %189, %184, %cst_62 {dimension_numbers = #tpu.dot_dimension_numbers<[1], [0], [0], [1], [0, 0, 1, 1], [], []>} : vector<16x32xbf16>, vector<32x96xbf16>, vector<16x96xf32> -> vector<16x96xf32>
    %191 = vector.extract_strided_slice %190 {offsets = [0, 0], sizes = [16, 8], strides = [1, 1]} : vector<16x96xf32> to vector<16x8xf32>
    %192 = vector.extract_strided_slice %190 {offsets = [0, 8], sizes = [16, 8], strides = [1, 1]} : vector<16x96xf32> to vector<16x8xf32>
    %193 = vector.extract_strided_slice %190 {offsets = [0, 16], sizes = [16, 8], strides = [1, 1]} : vector<16x96xf32> to vector<16x8xf32>
    %194 = vector.extract_strided_slice %190 {offsets = [0, 24], sizes = [16, 8], strides = [1, 1]} : vector<16x96xf32> to vector<16x8xf32>
    %195 = tpu.concatenate %191, %192, %193, %194 in 0 : vector<16x8xf32>, vector<16x8xf32>, vector<16x8xf32>, vector<16x8xf32> -> vector<64x8xf32>
    %196 = vector.extract_strided_slice %190 {offsets = [0, 32], sizes = [16, 8], strides = [1, 1]} : vector<16x96xf32> to vector<16x8xf32>
    %197 = vector.extract_strided_slice %190 {offsets = [0, 40], sizes = [16, 8], strides = [1, 1]} : vector<16x96xf32> to vector<16x8xf32>
    %198 = vector.extract_strided_slice %190 {offsets = [0, 48], sizes = [16, 8], strides = [1, 1]} : vector<16x96xf32> to vector<16x8xf32>
    %199 = vector.extract_strided_slice %190 {offsets = [0, 56], sizes = [16, 8], strides = [1, 1]} : vector<16x96xf32> to vector<16x8xf32>
    %200 = tpu.concatenate %196, %197, %198, %199 in 0 : vector<16x8xf32>, vector<16x8xf32>, vector<16x8xf32>, vector<16x8xf32> -> vector<64x8xf32>
    %201 = vector.extract_strided_slice %190 {offsets = [0, 64], sizes = [16, 8], strides = [1, 1]} : vector<16x96xf32> to vector<16x8xf32>
    %202 = vector.extract_strided_slice %190 {offsets = [0, 72], sizes = [16, 8], strides = [1, 1]} : vector<16x96xf32> to vector<16x8xf32>
    %203 = vector.extract_strided_slice %190 {offsets = [0, 80], sizes = [16, 8], strides = [1, 1]} : vector<16x96xf32> to vector<16x8xf32>
    %204 = vector.extract_strided_slice %190 {offsets = [0, 88], sizes = [16, 8], strides = [1, 1]} : vector<16x96xf32> to vector<16x8xf32>
    %205 = tpu.concatenate %201, %202, %203, %204 in 0 : vector<16x8xf32>, vector<16x8xf32>, vector<16x8xf32>, vector<16x8xf32> -> vector<64x8xf32>
    %206 = arith.truncf %195 : vector<64x8xf32> to vector<64x8xbf16>
    %207 = arith.truncf %200 : vector<64x8xf32> to vector<64x8xbf16>
    %cst_63 = arith.constant dense<0.000000e+00> : vector<64x64xf32>
    %208 = tpu.matmul %206, %207, %cst_63 {dimension_numbers = #tpu.dot_dimension_numbers<[1], [1], [0], [0], [0, 0, 1, 0], [], []>} : vector<64x8xbf16>, vector<64x8xbf16>, vector<64x64xf32> -> vector<64x64xf32>
    %209 = arith.addf %208, %60 : vector<64x64xf32>
    %cst_64 = arith.constant dense<0xFF800000> : vector<64xf32>
    %210 = vector.multi_reduction <maximumf>, %209, %cst_64 [1] : vector<64x64xf32> to vector<64xf32>
    %211 = vector.shape_cast %210 : vector<64xf32> to vector<64x1xf32>
    %212 = vector.broadcast %211 : vector<64x1xf32> to vector<64x64xf32>
    %213 = arith.subf %209, %212 : vector<64x64xf32>
    %214 = math.exp %213 : vector<64x64xf32>
    %cst_65 = arith.constant dense<0.000000e+00> : vector<64xf32>
    %215 = vector.multi_reduction <add>, %214, %cst_65 [1] : vector<64x64xf32> to vector<64xf32>
    %216 = vector.shape_cast %215 : vector<64xf32> to vector<64x1xf32>
    %217 = tpu.reciprocal %216 {approx = true} : vector<64x1xf32> -> vector<64x1xf32>
    %218 = vector.broadcast %217 : vector<64x1xf32> to vector<64x64xf32>
    %219 = arith.mulf %214, %218 : vector<64x64xf32>
    %220 = arith.truncf %219 : vector<64x64xf32> to vector<64x64xbf16>
    %221 = arith.truncf %205 : vector<64x8xf32> to vector<64x8xbf16>
    %cst_66 = arith.constant dense<0.000000e+00> : vector<64x8xf32>
    %222 = tpu.matmul %220, %221, %cst_66 {dimension_numbers = #tpu.dot_dimension_numbers<[1], [0], [0], [1], [0, 0, 1, 1], [], []>} : vector<64x64xbf16>, vector<64x8xbf16>, vector<64x8xf32> -> vector<64x8xf32>
    %223 = vector.extract_strided_slice %222 {offsets = [0, 0], sizes = [16, 8], strides = [1, 1]} : vector<64x8xf32> to vector<16x8xf32>
    %224 = vector.extract_strided_slice %222 {offsets = [16, 0], sizes = [16, 8], strides = [1, 1]} : vector<64x8xf32> to vector<16x8xf32>
    %225 = vector.extract_strided_slice %222 {offsets = [32, 0], sizes = [16, 8], strides = [1, 1]} : vector<64x8xf32> to vector<16x8xf32>
    %226 = vector.extract_strided_slice %222 {offsets = [48, 0], sizes = [16, 8], strides = [1, 1]} : vector<64x8xf32> to vector<16x8xf32>
    %227 = tpu.concatenate %223, %224, %225, %226 in 1 : vector<16x8xf32>, vector<16x8xf32>, vector<16x8xf32>, vector<16x8xf32> -> vector<16x32xf32>
    %228 = arith.truncf %227 : vector<16x32xf32> to vector<16x32xbf16>
    %cst_67 = arith.constant dense<0.000000e+00> : vector<16x32xf32>
    %229 = tpu.matmul %228, %186, %cst_67 {dimension_numbers = #tpu.dot_dimension_numbers<[1], [0], [0], [1], [0, 0, 1, 1], [], []>} : vector<16x32xbf16>, vector<32x32xbf16>, vector<16x32xf32> -> vector<16x32xf32>
    %230 = arith.addf %229, %174 : vector<16x32xf32>
    %cst_68 = arith.constant dense<0.000000e+00> : vector<16xf32>
    %231 = vector.multi_reduction <add>, %230, %cst_68 [1] : vector<16x32xf32> to vector<16xf32>
    %232 = vector.shape_cast %231 : vector<16xf32> to vector<16x1xf32>
    %cst_69 = arith.constant 3.200000e+01 : f32
    %233 = vector.broadcast %cst_69 : f32 to vector<16x1xf32>
    %234 = arith.divf %232, %233 : vector<16x1xf32>
    %235 = vector.broadcast %234 : vector<16x1xf32> to vector<16x32xf32>
    %236 = arith.subf %230, %235 : vector<16x32xf32>
    %237 = arith.mulf %236, %236 : vector<16x32xf32>
    %cst_70 = arith.constant dense<0.000000e+00> : vector<16xf32>
    %238 = vector.multi_reduction <add>, %237, %cst_70 [1] : vector<16x32xf32> to vector<16xf32>
    %239 = vector.shape_cast %238 : vector<16xf32> to vector<16x1xf32>
    %cst_71 = arith.constant 3.200000e+01 : f32
    %240 = vector.broadcast %cst_71 : f32 to vector<16x1xf32>
    %241 = arith.divf %239, %240 : vector<16x1xf32>
    %242 = vector.broadcast %234 : vector<16x1xf32> to vector<16x32xf32>
    %243 = arith.subf %230, %242 : vector<16x32xf32>
    %cst_72 = arith.constant 9.99999997E-7 : f32
    %244 = vector.broadcast %cst_72 : f32 to vector<16x1xf32>
    %245 = arith.addf %241, %244 : vector<16x1xf32>
    %246 = math.rsqrt %245 : vector<16x1xf32>
    %247 = vector.broadcast %246 : vector<16x1xf32> to vector<16x32xf32>
    %248 = arith.mulf %243, %247 : vector<16x32xf32>
    %249 = vector.broadcast %175 : vector<1x32xf32> to vector<16x32xf32>
    %250 = arith.mulf %248, %249 : vector<16x32xf32>
    %251 = vector.broadcast %176 : vector<1x32xf32> to vector<16x32xf32>
    %252 = arith.addf %250, %251 : vector<16x32xf32>
    %253 = arith.truncf %252 : vector<16x32xf32> to vector<16x32xbf16>
    %cst_73 = arith.constant dense<0.000000e+00> : vector<16x64xf32>
    %254 = tpu.matmul %253, %188, %cst_73 {dimension_numbers = #tpu.dot_dimension_numbers<[1], [0], [0], [1], [0, 0, 1, 1], [], []>} : vector<16x32xbf16>, vector<32x64xbf16>, vector<16x64xf32> -> vector<16x64xf32>
    %255 = vector.broadcast %177 : vector<1x64xf32> to vector<16x64xf32>
    %256 = arith.addf %254, %255 : vector<16x64xf32>
    %cst_74 = arith.constant 0.000000e+00 : f32
    %257 = vector.broadcast %cst_74 : f32 to vector<16x64xf32>
    %258 = arith.maximumf %256, %257 : vector<16x64xf32>
    %259 = arith.truncf %258 : vector<16x64xf32> to vector<16x64xbf16>
    %c1_75 = arith.constant 1 : index
    %c0_76 = arith.constant 0 : index
    %c0_77 = arith.constant 0 : index
    %260 = vector.load %arg4[%c1_75, %c0_76, %c0_77] : memref<2x64x32xf32, #tpu.memory_space<vmem>>, vector<1x64x32xf32>
    %261 = vector.shape_cast %260 : vector<1x64x32xf32> to vector<64x32xf32>
    %262 = arith.truncf %261 : vector<64x32xf32> to vector<64x32xbf16>
    %cst_78 = arith.constant dense<0.000000e+00> : vector<16x32xf32>
    %263 = tpu.matmul %259, %262, %cst_78 {dimension_numbers = #tpu.dot_dimension_numbers<[1], [0], [0], [1], [0, 0, 1, 1], [], []>} : vector<16x64xbf16>, vector<64x32xbf16>, vector<16x32xf32> -> vector<16x32xf32>
    %264 = vector.broadcast %178 : vector<1x32xf32> to vector<16x32xf32>
    %265 = arith.addf %263, %264 : vector<16x32xf32>
    %266 = arith.addf %265, %252 : vector<16x32xf32>
    %cst_79 = arith.constant dense<0.000000e+00> : vector<16xf32>
    %267 = vector.multi_reduction <add>, %266, %cst_79 [1] : vector<16x32xf32> to vector<16xf32>
    %268 = vector.shape_cast %267 : vector<16xf32> to vector<16x1xf32>
    %cst_80 = arith.constant 3.200000e+01 : f32
    %269 = vector.broadcast %cst_80 : f32 to vector<16x1xf32>
    %270 = arith.divf %268, %269 : vector<16x1xf32>
    %271 = vector.broadcast %270 : vector<16x1xf32> to vector<16x32xf32>
    %272 = arith.subf %266, %271 : vector<16x32xf32>
    %273 = arith.mulf %272, %272 : vector<16x32xf32>
    %cst_81 = arith.constant dense<0.000000e+00> : vector<16xf32>
    %274 = vector.multi_reduction <add>, %273, %cst_81 [1] : vector<16x32xf32> to vector<16xf32>
    %275 = vector.shape_cast %274 : vector<16xf32> to vector<16x1xf32>
    %cst_82 = arith.constant 3.200000e+01 : f32
    %276 = vector.broadcast %cst_82 : f32 to vector<16x1xf32>
    %277 = arith.divf %275, %276 : vector<16x1xf32>
    %278 = vector.broadcast %270 : vector<16x1xf32> to vector<16x32xf32>
    %279 = arith.subf %266, %278 : vector<16x32xf32>
    %cst_83 = arith.constant 9.99999997E-7 : f32
    %280 = vector.broadcast %cst_83 : f32 to vector<16x1xf32>
    %281 = arith.addf %277, %280 : vector<16x1xf32>
    %282 = math.rsqrt %281 : vector<16x1xf32>
    %283 = vector.broadcast %282 : vector<16x1xf32> to vector<16x32xf32>
    %284 = arith.mulf %279, %283 : vector<16x32xf32>
    %285 = vector.broadcast %179 : vector<1x32xf32> to vector<16x32xf32>
    %286 = arith.mulf %284, %285 : vector<16x32xf32>
    %287 = vector.broadcast %180 : vector<1x32xf32> to vector<16x32xf32>
    %288 = arith.addf %286, %287 : vector<16x32xf32>
    %289 = arith.truncf %288 : vector<16x32xf32> to vector<16x32xbf16>
    %c0_84 = arith.constant 0 : index
    %c0_85 = arith.constant 0 : index
    %290 = vector.load %arg6[%c0_84, %c0_85] : memref<32x128xf32, #tpu.memory_space<vmem>>, vector<32x128xf32>
    %291 = arith.truncf %290 : vector<32x128xf32> to vector<32x128xbf16>
    %cst_86 = arith.constant dense<0.000000e+00> : vector<16x128xf32>
    %292 = tpu.matmul %289, %291, %cst_86 {dimension_numbers = #tpu.dot_dimension_numbers<[1], [0], [0], [1], [0, 0, 1, 1], [], []>} : vector<16x32xbf16>, vector<32x128xbf16>, vector<16x128xf32> -> vector<16x128xf32>
    %c0_87 = arith.constant 0 : index
    %c0_88 = arith.constant 0 : index
    %293 = vector.load %arg7[%c0_87, %c0_88] : memref<16x128xf32, #tpu.memory_space<vmem>>, vector<16x128xf32>
    tpu.vector_store %arg7[%c0_87, %c0_88], %292 {strides = array<i32>} : memref<16x128xf32, #tpu.memory_space<vmem>>, vector<16x128xf32>,
    return
  }
}

</mosaic_0001>

<bundles_post_ra>
// kernel: tile.6
= control target key start
LH: loop header
LB: loop body
LE: loop exit
PB: predicated region body
PF: predicated region fallthrough
CT: control target
= control target key end

     0   :  { %v13_v2 = vmov 0   ;;  %s30_s0 = inlined_call_operand.vmem [shape: pred[16], index: 0, kind: input, shape index: {}]   ;;  %s31_s1 = inlined_call_operand.vmem [shape: pred[4,16], index: 1, kind: output, shape index: {}]  }
   0x1   :  { %v4_v0 = vld [vmem:[%s30_s0] ss:$0 sm:$0xff] }
   0x2   :  { %v7_v1 = vand.u32 255, %v4_v0 }
   0x4   :  { %v8_v3 = vpack.c.b16 %v13_v2, %v7_v1 }
   0x6   :  { %v9_v4 = vpack.c.b8 %v13_v2, %v8_v3 }
   0x8   :  { %11 = vst [vmem:[%s31_s1] sm:$0x1] %v9_v4 }

// kernel: transformer_forward.1
= control target key start
LH: loop header
LB: loop body
LE: loop exit
PB: predicated region body
PF: predicated region fallthrough
CT: control target
= control target key end

     0   :  { %v1966_v0 = vmov 0.0   ;;  %vm1967_vm0 = vmmov 0   ;;  %vm44_vm1 = vcmask 130048   ;;  %vm91_vm2 = vcmask 261120   ;;  %s1968_s29 = smov 112   ;;  %s1969_s30 = smov 120   ;;  %s2529_s5 = inlined_call_operand.vmem [shape: f32[16,32], index: 5, kind: input, shape index: {}]   ;;  %s2530_s0 = inlined_call_operand.vmem [shape: f32[16,16], index: 0, kind: input, shape index: {}]   ;;  %s2531_s2 = inlined_call_operand.vmem [shape: f32[33,64], index: 2, kind: input, shape index: {}]   ;;  %s2532_s3 = inlined_call_operand.vmem [shape: f32[2,32,192], index: 3, kind: input, shape index: {}]   ;;  %s2533_s1 = inlined_call_operand.vmem [shape: f32[64,64], index: 1, kind: input, shape index: {}]   ;;  %s2534_s4 = inlined_call_operand.vmem [shape: f32[2,64,32], index: 4, kind: input, shape index: {}]   ;;  %s2535_s6 = inlined_call_operand.vmem [shape: f32[32,128], index: 6, kind: input, shape index: {}]   ;;  %s2536_s7 = inlined_call_operand.vmem [shape: f32[16,128], index: 7, kind: output, shape index: {}]  }
   0x1   :  { %1649 = vmatprep.subr.bf16.mxu0 %v1966_v0  ;;  %v37_v1 = vld [vmem:[%s2529_s5] sm:$0xff]  ;;  %v38_v2 = vld [vmem:[%s2529_s5 + $0x8] sm:$0xff]  ;;  %1651 = vmatprep.mubr.msk.bf16.mxu0 %vm1967_vm0, %v1966_v0  ;;  %v1525_v7 = vld [vmem:[%s2531_s2 + $0x10] ss:$0 sm:$0xff]  ;;  %vm278_vm3 = vcmask 64512   ;;  %s1970_s8 = smov 104  }
   0x2   :  { %v34_v3 = vld [vmem:[%s2530_s0] sm:$0xff]  ;;  %v39_v4 = vpack.c.bf16 %v38_v2, %v37_v1  ;;  %v35_v5 = vld [vmem:[%s2530_s0 + $0x8] sm:$0xff]  ;;  %1655 = vmatprep.subr.bf16.mxu1 %v1966_v0  ;;  %1659 = vmatprep.mubr.msk.bf16.mxu1 %vm1967_vm0, %v1966_v0  ;;  %v1527_v35 = vld [vmem:[%s2531_s2 + $0x11] ss:$0 sm:$0xff]  ;;  %s1971_s5 = smov 96   ;;  %vm368_vm4 = vcmask 523264  }
   0x3   :  { %v36_v6 = vpack.c.bf16 %v35_v5, %v34_v3  ;;  %v1528_v37 = vld [vmem:[%s2531_s2 + $0x12] ss:$0 sm:$0xff]  ;;  %v27_v40 = vld [vmem:[%s2531_s2] sm:$0xff]  ;;  %v28_v45 = vld [vmem:[%s2531_s2 + $0x8] sm:$0xff]  ;;  %s1972_s24 = smov 64   ;;  %s1974_s25 = smov 8  }
   0x4   :  { %1650 = vmatpush3.bf16.msra.mxu0 %v39_v4  ;;  %v185_v60 = vld [vmem:[%s2532_s3] sm:$0xff]  ;;  %v187_v61 = vld [vmem:[%s2532_s3 + $0x10] sm:$0xff]  ;;  %s1975_s26 = smov 24   ;;  %s1976_s27 = smov 16   ;;  %vm578_vm5 = vcmask 195584  }
   0x5   :  { %v2065_v62 = vpack.c.bf16 %v187_v61, %v185_v60  ;;  %v189_v63 = vld [vmem:[%s2532_s3 + $0x20] sm:$0xff]  ;;  %v191_v1 = vld [vmem:[%s2532_s3 + $0x30] sm:$0xff] }
   0x6   :  { %v2074_v2 = vpack.c.bf16 %v191_v1, %v189_v63  ;;  %v2159_v61 = vld [vmem:[%s2533_s1 + $0x20] sm:$0xff]  ;;  %v2164_v1 = vld [vmem:[%s2533_s1 + $0x30] sm:$0xff] }
   0x7   :  { %1652 = vmatmul.mubr.msk.bf16.vlgmr.msra.gmra.mrb[0].mxu0 %vm44_vm1, %v36_v6  ;;  %1656 = vmatpush3.bf16.msra.mxu1 %v2065_v62 }
   0x8   :  { %1657 = vmatprep.subr.bf16.mxu1 %v1966_v0 }
   0xb   :  { %1658 = vmatpush3.bf16.msra.mxu1 %v2074_v2 }
  0xda   :  { %v82_v8 = vpop.f32.mrb[0].mxu0 }
  0xdb   :  { %v83_v9 = vadd.f32 %v1525_v7, %v82_v8  ;;  %v1653_v10 = vpop.f32.mrb[1].mxu0 }
  0xdc   :  { %v85_v11 = vpop.f32.mrb[2].mxu0 }
  0xdd   :  { %v89_v12 = vmax.f32 %v83_v9, 0.0  ;;  %v86_v13 = vadd.f32 %v1525_v7, %v85_v11  ;;  %v1654_v14 = vpop.f32.mrb[3].mxu0  ;;  %v1529_v11 = vld [vmem:[%s2531_s2 + $0x13] ss:$0 sm:$0xff] }
  0xdf   :  { %v90_v15 = vmax.f32 %v86_v13, 0.0  ;;  %v92_v16 = vsel %vm91_vm2, %v89_v12, 0.0 }
  0xe0   :  { %93 = vadd.xlane.f32.xlu0 %v92_v16 }
  0xe1   :  { %v95_v17 = vsel %vm91_vm2, %v90_v15, 0.0 }
  0xe4   :  { %96 = vadd.xlane.f32.xlu0 %v95_v17 }
 0x16d   :  { %v94_v18 = vpop.xlane.xlu0 %93 }
 0x16e   :  { %v99_v19 = vmul.f32 0.03125, %v94_v18 }
 0x170   :  { %v101_v20 = vsub.f32 %v89_v12, %v99_v19 }
 0x171   :  { %v97_v21 = vpop.xlane.xlu0 %96 }
 0x172   :  { %v100_v22 = vmul.f32 0.03125, %v97_v21  ;;  %v103_v23 = vmul.f32 %v101_v20, %v101_v20 }
 0x174   :  { %v102_v24 = vsub.f32 %v90_v15, %v100_v22  ;;  %v105_v25 = vsel %vm91_vm2, %v103_v23, 0.0  ;;  %v1530_v15 = vld [vmem:[%s2531_s2 + $0x14] ss:$0 sm:$0xff] }
 0x175   :  { %106 = vadd.xlane.f32.xlu1 %v105_v25 }
 0x176   :  { %v104_v26 = vmul.f32 %v102_v24, %v102_v24 }
 0x178   :  { %v108_v27 = vsel %vm91_vm2, %v104_v26, 0.0 }
 0x179   :  { %109 = vadd.xlane.f32.xlu1 %v108_v27 }
 0x202   :  { %v107_v28 = vpop.xlane.xlu1 %106 }
 0x203   :  { %v111_v29 = vmul.f32 0.03125, %v107_v28 }
 0x205   :  { %v113_v30 = vadd.f32 1e-06, %v111_v29 }
 0x206   :  { %v110_v31 = vpop.xlane.xlu1 %109 }
 0x207   :  { %1878 = vrsqrt.f32 %v113_v30  ;;  %v112_v32 = vmul.f32 0.03125, %v110_v31 }
 0x209   :  { %v114_v33 = vadd.f32 1e-06, %v112_v32 }
 0x20b   :  { %1880 = vrsqrt.f32 %v114_v33 }
 0x211   :  { %v1879_v34 = vpop.eup %1878 }
 0x212   :  { %v117_v36 = vmul.f32 %v1879_v34, %v101_v20 }
 0x214   :  { %v123_v38 = vmul.f32 %v1527_v35, %v117_v36 }
 0x215   :  { %v1881_v39 = vpop.eup %1880 }
 0x216   :  { %v129_v41 = vadd.f32 %v1528_v37, %v123_v38  ;;  %v118_v42 = vmul.f32 %v1881_v39, %v102_v24 }
 0x218   :  { %v131_v43 = vadd.f32 %v129_v41, %v27_v40  ;;  %v124_v44 = vmul.f32 %v1527_v35, %v118_v42 }
 0x21a   :  { %v133_v46 = vsel %vm91_vm2, %v131_v43, 0.0  ;;  %v130_v47 = vadd.f32 %v1528_v37, %v124_v44 }
 0x21b   :  { %134 = vadd.xlane.f32.xlu0 %v133_v46  ;;  %v2132_v46 = vld [vmem:[%s2533_s1 + $0x10] sm:$0xff] }
 0x21c   :  { %v132_v48 = vadd.f32 %v130_v47, %v28_v45  ;;  %v2137_v47 = vld [vmem:[%s2533_s1] sm:$0xff] }
 0x21e   :  { %v136_v49 = vsel %vm91_vm2, %v132_v48, 0.0 }
 0x21f   :  { %137 = vadd.xlane.f32.xlu1 %v136_v49 }
 0x2a8   :  { %v135_v50 = vpop.xlane.xlu0 %134 }
 0x2a9   :  { %v139_v51 = vmul.f32 0.03125, %v135_v50 }
 0x2ab   :  { %v141_v52 = vsub.f32 %v131_v43, %v139_v51  ;;  %v2143_v51 = vld [vmem:[%s2533_s1 + $0x8] sm:$0xff] }
 0x2ac   :  { %v138_v53 = vpop.xlane.xlu1 %137 }
 0x2ad   :  { %v140_v54 = vmul.f32 0.03125, %v138_v53  ;;  %v143_v55 = vmul.f32 %v141_v52, %v141_v52 }
 0x2af   :  { %v142_v56 = vsub.f32 %v132_v48, %v140_v54  ;;  %v145_v57 = vsel %vm91_vm2, %v143_v55, 0.0 }
 0x2b0   :  { %146 = vadd.xlane.f32.xlu0 %v145_v57 }
 0x2b1   :  { %v144_v58 = vmul.f32 %v142_v56, %v142_v56 }
 0x2b3   :  { %v148_v59 = vsel %vm91_vm2, %v144_v58, 0.0 }
 0x2b4   :  { %149 = vadd.xlane.f32.xlu1 %v148_v59 }
 0x33d   :  { %v147_v3 = vpop.xlane.xlu0 %146 }
 0x33e   :  { %v151_v4 = vmul.f32 0.03125, %v147_v3 }
 0x340   :  { %v153_v5 = vadd.f32 1e-06, %v151_v4  ;;  %v2169_v4 = vld [vmem:[%s2533_s1 + $0x28] sm:$0xff] }
 0x341   :  { %v150_v6 = vpop.xlane.xlu1 %149 }
 0x342   :  { %1882 = vrsqrt.f32 %v153_v5  ;;  %v152_v7 = vmul.f32 0.03125, %v150_v6 }
 0x344   :  { %v154_v8 = vadd.f32 1e-06, %v152_v7 }
 0x346   :  { %1884 = vrsqrt.f32 %v154_v8 }
 0x34c   :  { %v1883_v9 = vpop.eup %1882 }
 0x34d   :  { %v157_v10 = vmul.f32 %v1883_v9, %v141_v52 }
 0x34f   :  { %v163_v14 = vmul.f32 %v1529_v11, %v157_v10  ;;  %v2177_v10 = vld [vmem:[%s2533_s1 + $0x38] sm:$0xff] }
 0x350   :  { %v1885_v12 = vpop.eup %1884 }
 0x351   :  { %v158_v13 = vmul.f32 %v1885_v12, %v142_v56  ;;  %v2084_v17 = vadd.f32 %v1530_v15, %v163_v14  ;;  %v2150_v56 = vld [vmem:[%s2533_s1 + $0x18] sm:$0xff]  ;;  %s1973_s1 = smov 32  }
 0x353   :  { %v164_v16 = vmul.f32 %v1529_v11, %v158_v13 }
 0x355   :  { %v2086_v18 = vadd.f32 %v1530_v15, %v164_v16 }
 0x357   :  { %v197_v19 = vpack.c.bf16 %v2086_v18, %v2084_v17 }
 0x359   :  { %1660 = vmatmul.mubr.msk.bf16.vlgmr.msra.gmra.mrb[0].mxu1 %vm91_vm2, %v197_v19 }
 0x42c   :  { %v235_v20 = vpop.f32.mrb[0].mxu1 }
 0x42d   :  { %v1661_v21 = vpop.f32.mrb[1].mxu1 }
 0x42e   :  { %v238_v22 = vpop.f32.mrb[2].mxu1 }
 0x42f   :  { %v2091_v23 = vpack.c.bf16 %v238_v22, %v235_v20  ;;  %v1662_v24 = vpop.f32.mrb[3].mxu1  ;;  %v1823_v25 = vpack.i.bf16 %v238_v22, %v235_v20 }
 0x431   :  { %1824 = vrot.lane.b32.xlu1 %v1823_v25, %s1968_s29  ;;  %1819 = vrot.lane.b32.xlu0 %v1823_v25, %s1969_s30 }
 0x432   :  { %1671 = vmatprep.mubr.msk.bf16.mxu0 %vm278_vm3, %v2091_v23 }
 0x435   :  { %1829 = vrot.lane.b32.xlu1 %v1823_v25, %s1970_s8 }
 0x439   :  { %270 = vrot.lane.b32.xlu1 %v2091_v23, %s1971_s5 }
 0x4a3   :  { %v1825_v26 = vpop.permute.xlu1 %1824  ;;  %v1820_v27 = vpop.permute.xlu0 %1819 }
 0x4a4   :  { %v1827_v28 = vunpack.i.h.bf16 %v1825_v26  ;;  %v1826_v29 = vunpack.i.l.bf16 %v1825_v26  ;;  %v1822_v30 = vunpack.i.h.bf16 %v1820_v27  ;;  %v1821_v31 = vunpack.i.l.bf16 %v1820_v27 }
 0x4a6   :  { %v2100_v32 = vpack.c.bf16 %v1827_v28, %v1826_v29  ;;  %v2102_v33 = vpack.c.bf16 %v1822_v30, %v1821_v31 }
 0x4a7   :  { %v1830_v34 = vpop.permute.xlu1 %1829 }
 0x4a8   :  { %v1832_v35 = vunpack.i.h.bf16 %v1830_v34  ;;  %v1831_v36 = vunpack.i.l.bf16 %v1830_v34  ;;  %272 = vrot.lane.b32.xlu0 %v2102_v33, %s1971_s5  ;;  %274 = vrot.lane.b32.xlu1 %v2100_v32, %s1971_s5 }
 0x4aa   :  { %v2108_v37 = vpack.c.bf16 %v1832_v35, %v1831_v36 }
 0x4ab   :  { %v271_v38 = vpop.permute.xlu1 %270 }
 0x4ac   :  { %v292_v39 = vsel %vm278_vm3, %v271_v38, 0  ;;  %276 = vrot.lane.b32.xlu0 %v2108_v37, %s1971_s5  ;;  %1799 = vmatprep.subr.msk.bf16.mxu0 %vm278_vm3, %v271_v38 }
 0x4ad   :  { %1664 = vmatpush3.bf16.xpose.msra.mxu0 %v292_v39 }
 0x51a   :  { %v273_v40 = vpop.permute.xlu0 %272  ;;  %v275_v42 = vpop.permute.xlu1 %274 }
 0x51b   :  { %v295_v41 = vsel %vm278_vm3, %v273_v40, 0  ;;  %1800 = vmatprep.subr.msk.bf16.mxu0 %vm278_vm3, %v273_v40  ;;  %v298_v43 = vsel %vm278_vm3, %v275_v42, 0 }
 0x51c   :  { %1666 = vmatpush3.bf16.xpose.msra.mxu0 %v295_v41 }
 0x51d   :  { %1801 = vmatprep.subr.msk.bf16.mxu0 %vm278_vm3, %v275_v42 }
 0x51e   :  { %v277_v44 = vpop.permute.xlu0 %276 }
 0x51f   :  { %v301_v45 = vsel %vm278_vm3, %v277_v44, 0 }
 0x524   :  { %1668 = vmatpush3.bf16.xpose.msra.mxu0 %v298_v43 }
 0x525   :  { %1802 = vmatprep.subr.msk.bf16.mxu0 %vm278_vm3, %v277_v44 }
 0x52c   :  { %1670 = vmatpush3.bf16.xpose.msra.mxu0 %v301_v45 }
 0x52d   :  { %1711 = vmatprep.subr.bf16.mxu0 %v1966_v0 }
 0x533   :  { %1672 = vmatmul.mubr.msk.bf16.vlgmr.msra.gmra.mrb[4].mxu0 %vm278_vm3, %v2102_v33 }
 0x534   :  { %1675 = vmatprep.mubr.msk.bf16.mxu0 %vm278_vm3, %v2100_v32 }
 0x53b   :  { %1676 = vmatmul.mubr.msk.bf16.gmra.mrb[8].mxu0 %vm278_vm3, %v2108_v37 }
 0x53c   :  { %1719 = vmatprep.mubr.msk.bf16.mxu0 %vm1967_vm0, %v1966_v0 }
 0x606   :  { %v1673_v48 = vpop.f32.mrb[4].mxu0 }
 0x607   :  { %v346_v49 = vadd.f32 %v1673_v48, %v2132_v46  ;;  %v337_v50 = vpop.f32.mrb[5].mxu0 }
 0x608   :  { %v338_v52 = vadd.f32 %v337_v50, %v2137_v47  ;;  %v1674_v53 = vpop.f32.mrb[6].mxu0 }
 0x609   :  { %v340_v54 = vpop.f32.mrb[7].mxu0  ;;  %v375_v55 = vsel %vm368_vm4, %v346_v49, -inf  ;;  %v349_v60 = vadd.f32 %v1674_v53, %v2150_v56 }
 0x60a   :  { %v341_v57 = vadd.f32 %v340_v54, %v2143_v51  ;;  %376 = vmax.xlane.f32.xlu0 %v375_v55  ;;  %v369_v58 = vsel %vm368_vm4, %v338_v52, -inf }
 0x60b   :  { %370 = vmax.xlane.f32.xlu1 %v369_v58  ;;  %v378_v8 = vsel %vm368_vm4, %v349_v60, -inf }
 0x60c   :  { %v372_v59 = vsel %vm368_vm4, %v341_v57, -inf }
 0x60e   :  { %v1677_v63 = vpop.f32.mrb[8].mxu0  ;;  %373 = vmax.xlane.f32.xlu0 %v372_v59 }
 0x60f   :  { %v353_v3 = vpop.f32.mrb[9].mxu0  ;;  %v362_v9 = vadd.f32 %v1677_v63, %v2164_v1 }
 0x610   :  { %v354_v5 = vadd.f32 %v353_v3, %v2159_v61  ;;  %v1678_v6 = vpop.f32.mrb[10].mxu0 }
 0x611   :  { %v356_v7 = vpop.f32.mrb[11].mxu0  ;;  %v365_v14 = vadd.f32 %v1678_v6, %v2177_v10  ;;  %v387_v15 = vsel %vm368_vm4, %v362_v9, -inf }
 0x612   :  { %v357_v11 = vadd.f32 %v356_v7, %v2169_v4  ;;  %379 = vmax.xlane.f32.xlu0 %v378_v8  ;;  %v381_v12 = vsel %vm368_vm4, %v354_v5, -inf }
 0x613   :  { %382 = vmax.xlane.f32.xlu1 %v381_v12  ;;  %v390_v16 = vsel %vm368_vm4, %v365_v14, -inf }
 0x614   :  { %v384_v13 = vsel %vm368_vm4, %v357_v11, -inf }
 0x616   :  { %385 = vmax.xlane.f32.xlu0 %v384_v13 }
 0x617   :  { %388 = vmax.xlane.f32.xlu1 %v387_v15 }
 0x61a   :  { %391 = vmax.xlane.f32.xlu0 %v390_v16 }
 0x628   :  { %461 = vrot.lane.b32.xlu1 %v2091_v23, %s1972_s24 }
 0x697   :  { %v377_v19 = vpop.xlane.xlu0 %376 }
 0x698   :  { %v395_v20 = vsub.f32 %v346_v49, %v377_v19  ;;  %v371_v21 = vpop.xlane.xlu1 %370 }
 0x699   :  { %v393_v22 = vsub.f32 %v338_v52, %v371_v21 }
 0x69a   :  { %v405_v24 = vmul.f32 1.442695, %v395_v20 }
 0x69b   :  { %v401_v25 = vmul.f32 1.442695, %v393_v22  ;;  %v374_v26 = vpop.xlane.xlu0 %373 }
 0x69c   :  { %1886 = vpow2.f32 %v405_v24  ;;  %v394_v27 = vsub.f32 %v341_v57, %v374_v26 }
 0x69d   :  { %1888 = vpow2.f32 %v401_v25 }
 0x69e   :  { %v403_v31 = vmul.f32 1.442695, %v394_v27 }
 0x69f   :  { %v380_v28 = vpop.xlane.xlu0 %379 }
 0x6a0   :  { %v396_v29 = vsub.f32 %v349_v60, %v380_v28  ;;  %v383_v30 = vpop.xlane.xlu1 %382 }
 0x6a1   :  { %v397_v35 = vsub.f32 %v354_v5, %v383_v30 }
 0x6a2   :  { %v407_v34 = vmul.f32 1.442695, %v396_v29 }
 0x6a3   :  { %v386_v36 = vpop.xlane.xlu0 %385  ;;  %v409_v41 = vmul.f32 1.442695, %v397_v35 }
 0x6a4   :  { %1890 = vpow2.f32 %v407_v34  ;;  %v389_v38 = vpop.xlane.xlu1 %388  ;;  %v398_v40 = vsub.f32 %v357_v11, %v386_v36 }
 0x6a5   :  { %v399_v23 = vsub.f32 %v362_v9, %v389_v38  ;;  %1892 = vpow2.f32 %v403_v31 }
 0x6a6   :  { %v2187_v39 = vpop.eup %1886  ;;  %v411_v50 = vmul.f32 1.442695, %v398_v40 }
 0x6a7   :  { %v413_v42 = vmul.f32 1.442695, %v399_v23  ;;  %v392_v43 = vpop.xlane.xlu0 %391  ;;  %v423_v44 = vsel %vm368_vm4, %v2187_v39, 0.0  ;;  %v1889_v45 = vpop.eup %1888 }
 0x6a8   :  { %v400_v48 = vsub.f32 %v365_v14, %v392_v43  ;;  %424 = vadd.xlane.f32.xlu1 %v423_v44  ;;  %v462_v49 = vpop.permute.xlu1 %461  ;;  %v417_v53 = vsel %vm368_vm4, %v1889_v45, 0.0 }
 0x6a9   :  { %1894 = vpow2.f32 %v413_v42  ;;  %1679 = vmatprep.subr.bf16.mxu1 %v462_v49 }
 0x6aa   :  { %v415_v52 = vmul.f32 1.442695, %v400_v48  ;;  %1680 = vmatpush3.bf16.msra.mxu1 %v462_v49  ;;  %1896 = vpow2.f32 %v409_v41 }
 0x6ac   :  { %1898 = vpow2.f32 %v415_v52  ;;  %418 = vadd.xlane.f32.xlu1 %v417_v53 }
 0x6ad   :  { %1900 = vpow2.f32 %v411_v50 }
 0x6ae   :  { %v1891_v54 = vpop.eup %1890 }
 0x6af   :  { %v426_v55 = vsel %vm368_vm4, %v1891_v54, 0.0  ;;  %v1893_v57 = vpop.eup %1892 }
 0x6b0   :  { %427 = vadd.xlane.f32.xlu0 %v426_v55  ;;  %v420_v59 = vsel %vm368_vm4, %v1893_v57, 0.0 }
 0x6b3   :  { %v2193_v58 = vpop.eup %1894 }
 0x6b4   :  { %421 = vadd.xlane.f32.xlu0 %v420_v59  ;;  %v435_v60 = vsel %vm368_vm4, %v2193_v58, 0.0  ;;  %v1897_v63 = vpop.eup %1896 }
 0x6b5   :  { %436 = vadd.xlane.f32.xlu1 %v435_v60  ;;  %v429_v7 = vsel %vm368_vm4, %v1897_v63, 0.0 }
 0x6b6   :  { %v1899_v3 = vpop.eup %1898 }
 0x6b7   :  { %v438_v5 = vsel %vm368_vm4, %v1899_v3, 0.0  ;;  %v1901_v6 = vpop.eup %1900 }
 0x6b8   :  { %439 = vadd.xlane.f32.xlu0 %v438_v5  ;;  %v432_v8 = vsel %vm368_vm4, %v1901_v6, 0.0 }
 0x6b9   :  { %430 = vadd.xlane.f32.xlu1 %v429_v7 }
 0x6bc   :  { %433 = vadd.xlane.f32.xlu0 %v432_v8 }
 0x6ca   :  { %465 = vrot.lane.b32.xlu1 %v2100_v32, %s1972_s24 }
 0x6ce   :  { %467 = vrot.lane.b32.xlu1 %v2108_v37, %s1972_s24 }
 0x6d2   :  { %463 = vrot.lane.b32.xlu0 %v2102_v33, %s1972_s24  ;;  %584 = vrot.lane.b32.xlu1 %v2065_v62, %s1973_s1 }
 0x735   :  { %v425_v9 = vpop.xlane.xlu1 %424 }
 0x739   :  { %v419_v11 = vpop.xlane.xlu1 %418 }
 0x73a   :  { %1902 = vrcp.f32 %v419_v11 }
 0x73d   :  { %v428_v12 = vpop.xlane.xlu0 %427 }
 0x741   :  { %v422_v13 = vpop.xlane.xlu0 %421 }
 0x742   :  { %1904 = vrcp.f32 %v422_v13  ;;  %v437_v14 = vpop.xlane.xlu1 %436 }
 0x743   :  { %1906 = vrcp.f32 %v428_v12 }
 0x744   :  { %1908 = vrcp.f32 %v425_v9  ;;  %v1903_v32 = vpop.eup %1902 }
 0x745   :  { %v440_v15 = vpop.xlane.xlu0 %439  ;;  %v449_v22 = vmul.f32 %v1903_v32, %v1889_v45 }
 0x746   :  { %v431_v16 = vpop.xlane.xlu1 %430 }
 0x747   :  { %1910 = vrcp.f32 %v431_v16 }
 0x749   :  { %v434_v19 = vpop.xlane.xlu0 %433 }
 0x74a   :  { %1912 = vrcp.f32 %v434_v19  ;;  %v466_v37 = vpop.permute.xlu1 %465 }
 0x74b   :  { %1914 = vrcp.f32 %v440_v15 }
 0x74c   :  { %v1905_v20 = vpop.eup %1904  ;;  %1916 = vrcp.f32 %v437_v14 }
 0x74d   :  { %v464_v21 = vpop.permute.xlu0 %463  ;;  %v450_v33 = vmul.f32 %v1905_v20, %v1893_v57  ;;  %v1907_v25 = vpop.eup %1906 }
 0x74e   :  { %1681 = vmatprep.subr.bf16.mxu1 %v464_v21  ;;  %v1909_v26 = vpop.eup %1908  ;;  %v468_v28 = vpop.permute.xlu1 %467  ;;  %v452_v30 = vmul.f32 %v1907_v25, %v1891_v54 }
 0x74f   :  { %1682 = vmatpush3.bf16.msra.mxu1 %v464_v21  ;;  %v457_v24 = vpack.c.bf16 %v450_v33, %v449_v22  ;;  %v451_v34 = vmul.f32 %v1909_v26, %v2187_v39 }
 0x750   :  { %1683 = vmatprep.subr.bf16.mxu1 %v466_v37 }
 0x751   :  { %1687 = vmatprep.mubr.msk.bf16.mxu1 %vm368_vm4, %v457_v24  ;;  %v1911_v27 = vpop.eup %1910  ;;  %v458_v36 = vpack.c.bf16 %v452_v30, %v451_v34 }
 0x752   :  { %v453_v35 = vmul.f32 %v1911_v27, %v1897_v63  ;;  %v585_v39 = vpop.permute.xlu1 %584 }
 0x753   :  { %1684 = vmatpush3.bf16.msra.mxu1 %v466_v37 }
 0x754   :  { %v1913_v29 = vpop.eup %1912  ;;  %1685 = vmatprep.subr.bf16.mxu1 %v468_v28 }
 0x755   :  { %v454_v31 = vmul.f32 %v1913_v29, %v1901_v6  ;;  %v1915_v38 = vpop.eup %1914 }
 0x756   :  { %v1917_v40 = vpop.eup %1916  ;;  %v456_v41 = vmul.f32 %v1915_v38, %v1899_v3 }
 0x757   :  { %1686 = vmatpush3.bf16.msra.mxu1 %v468_v28  ;;  %v459_v23 = vpack.c.bf16 %v454_v31, %v453_v35  ;;  %v455_v42 = vmul.f32 %v1917_v40, %v2193_v58  ;;  %v186_v35 = vld [vmem:[%s2532_s3 + $0x8] sm:$0xff]  ;;  %v192_v40 = vld [vmem:[%s2532_s3 + $0x38] sm:$0xff] }
 0x758   :  { %1695 = vmatprep.subr.bf16.mxu1 %v1966_v0 }
 0x759   :  { %v460_v43 = vpack.c.bf16 %v456_v41, %v455_v42  ;;  %v724_v42 = vld [vmem:[%s2534_s4] sm:$0xff] }
 0x75a   :  { %1688 = vmatmul.mubr.msk.bf16.vlgmr.msra.gmra.mrb[4].mxu1 %vm368_vm4, %v458_v36  ;;  %v188_v36 = vld [vmem:[%s2532_s3 + $0x18] sm:$0xff] }
 0x75b   :  { %1691 = vmatprep.mubr.msk.bf16.mxu1 %vm368_vm4, %v459_v23  ;;  %1696 = vmatpush3.bf16.msra.mxu1 %v585_v39  ;;  %v195_v38 = vpack.c.bf16 %v188_v36, %v186_v35  ;;  %v190_v23 = vld [vmem:[%s2532_s3 + $0x28] sm:$0xff]  ;;  %v726_v39 = vld [vmem:[%s2534_s4 + $0x10] sm:$0xff] }
 0x75c   :  { %1697 = vmatprep.subr.bf16.mxu1 %v1966_v0  ;;  %v196_v41 = vpack.c.bf16 %v192_v40, %v190_v23 }
 0x762   :  { %1692 = vmatmul.mubr.msk.bf16.gmra.mrb[8].mxu1 %vm368_vm4, %v460_v43  ;;  %v725_v43 = vld [vmem:[%s2534_s4 + $0x8] sm:$0xff] }
 0x763   :  { %1699 = vmatprep.mubr.msk.bf16.mxu1 %vm1967_vm0, %v1966_v0 }
 0x82d   :  { %v1689_v44 = vpop.f32.mrb[4].mxu1 }
 0x82e   :  { %v519_v45 = vpop.f32.mrb[5].mxu1 }
 0x82f   :  { %v1690_v48 = vpop.f32.mrb[6].mxu1 }
 0x830   :  { %v1833_v49 = vpack.i.bf16 %v1690_v48, %v1689_v44  ;;  %v522_v50 = vpop.f32.mrb[7].mxu1  ;;  %v732_v44 = vpack.c.bf16 %v725_v43, %v724_v42 }
 0x832   :  { %1834 = vrot.lane.b32.xlu0 %v1833_v49, %s1974_s25  ;;  %1712 = vmatpush3.bf16.msra.mxu0 %v732_v44 }
 0x833   :  { %1713 = vmatprep.subr.bf16.mxu0 %v1966_v0 }
 0x835   :  { %v1693_v52 = vpop.f32.mrb[8].mxu1 }
 0x836   :  { %v535_v53 = vpop.f32.mrb[9].mxu1 }
 0x837   :  { %v1694_v54 = vpop.f32.mrb[10].mxu1 }
 0x838   :  { %v1838_v55 = vpack.i.bf16 %v1694_v54, %v1693_v52  ;;  %v538_v57 = vpop.f32.mrb[11].mxu1 }
 0x839   :  { %v1843_v58 = vpack.i.bf16 %v538_v57, %v535_v53 }
 0x83a   :  { %1839 = vrot.lane.b32.xlu0 %v1838_v55, %s1975_s26 }
 0x83b   :  { %1844 = vrot.lane.b32.xlu1 %v1843_v58, %s1976_s27 }
 0x83f   :  { %586 = vrot.lane.b32.xlu1 %v2074_v2, %s1973_s1 }
 0x8a4   :  { %v1835_v62 = vpop.permute.xlu0 %1834 }
 0x8a5   :  { %v1837_v59 = vunpack.i.h.bf16 %v1835_v62  ;;  %v1836_v60 = vunpack.i.l.bf16 %v1835_v62  ;;  %v1541_v62 = vld [vmem:[%s2531_s2 + $0x15] ss:$0 sm:$0xff] }
 0x8a7   :  { %v574_v7 = vsel %vm278_vm3, %v519_v45, %v1836_v60  ;;  %v575_v8 = vsel %vm278_vm3, %v522_v50, %v1837_v59  ;;  %v727_v45 = vld [vmem:[%s2534_s4 + $0x18] sm:$0xff] }
 0x8a8   :  { %v733_v48 = vpack.c.bf16 %v727_v45, %v726_v39 }
 0x8aa   :  { %1714 = vmatpush3.bf16.msra.mxu0 %v733_v48  ;;  %v1549_v48 = vld [vmem:[%s2532_s3 + $0x40] sm:$0xff] }
 0x8ab   :  { %1715 = vmatprep.subr.bf16.mxu0 %v1966_v0 }
 0x8ac   :  { %v1840_v63 = vpop.permute.xlu0 %1839 }
 0x8ad   :  { %v1845_v3 = vpop.permute.xlu1 %1844  ;;  %v1842_v9 = vunpack.i.h.bf16 %v1840_v63  ;;  %v1841_v11 = vunpack.i.l.bf16 %v1840_v63 }
 0x8ae   :  { %v1847_v5 = vunpack.i.h.bf16 %v1845_v3  ;;  %v1846_v6 = vunpack.i.l.bf16 %v1845_v3  ;;  %v1542_v3 = vld [vmem:[%s2531_s2 + $0x16] ss:$0 sm:$0xff] }
 0x8b0   :  { %v577_v12 = vsel %vm44_vm1, %v575_v8, %v1847_v5  ;;  %v576_v13 = vsel %vm44_vm1, %v574_v7, %v1846_v6 }
 0x8b1   :  { %v580_v2 = vsel %vm578_vm5, %v577_v12, %v1842_v9  ;;  %v579_v14 = vsel %vm578_vm5, %v576_v13, %v1841_v11  ;;  %v587_v15 = vpop.permute.xlu1 %586  ;;  %v728_v9 = vld [vmem:[%s2534_s4 + $0x20] sm:$0xff]  ;;  %v729_v11 = vld [vmem:[%s2534_s4 + $0x28] sm:$0xff]  ;;  %v730_v13 = vld [vmem:[%s2534_s4 + $0x30] sm:$0xff] }
 0x8b2   :  { %v581_v16 = vpack.c.bf16 %v580_v2, %v579_v14  ;;  %1698 = vmatpush3.bf16.msra.mxu1 %v587_v15  ;;  %v734_v12 = vpack.c.bf16 %v729_v11, %v728_v9  ;;  %v731_v2 = vld [vmem:[%s2534_s4 + $0x38] sm:$0xff]  ;;  %v1543_v15 = vld [vmem:[%s2531_s2 + $0x17] ss:$0 sm:$0xff] }
 0x8b3   :  { %1703 = vmatprep.subr.bf16.mxu1 %v1966_v0  ;;  %v735_v14 = vpack.c.bf16 %v731_v2, %v730_v13  ;;  %v1548_v9 = vld [vmem:[%s2531_s2 + $0x1a] ss:$0 sm:$0xff] }
 0x8b4   :  { %1716 = vmatpush3.bf16.msra.mxu0 %v734_v12 }
 0x8b5   :  { %1700 = vmatmul.mubr.msk.bf16.vlgmr.msra.gmra.mrb[12].mxu1 %vm91_vm2, %v581_v16  ;;  %1717 = vmatprep.subr.bf16.mxu0 %v1966_v0 }
 0x8b6   :  { %1707 = vmatprep.mubr.msk.bf16.mxu1 %vm1967_vm0, %v1966_v0  ;;  %1704 = vmatpush3.bf16.msra.mxu1 %v195_v38 }
 0x8b7   :  { %1705 = vmatprep.subr.bf16.mxu1 %v1966_v0 }
 0x8b8   :  { %1718 = vmatpush3.bf16.msra.mxu0 %v735_v14 }
 0x8ba   :  { %1706 = vmatpush3.bf16.msra.mxu1 %v196_v41 }
 0x8bb   :  { %1723 = vmatprep.subr.bf16.mxu1 %v1966_v0 }
 0x988   :  { %v627_v19 = vpop.f32.mrb[12].mxu1 }
 0x989   :  { %v628_v32 = vadd.f32 %v627_v19, %v2084_v17  ;;  %v1701_v20 = vpop.f32.mrb[13].mxu1 }
 0x98a   :  { %v630_v37 = vpop.f32.mrb[14].mxu1 }
 0x98b   :  { %v631_v21 = vadd.f32 %v630_v37, %v2086_v18  ;;  %v1702_v22 = vpop.f32.mrb[15].mxu1  ;;  %v634_v33 = vsel %vm91_vm2, %v628_v32, 0.0 }
 0x98c   :  { %635 = vadd.xlane.f32.xlu0 %v634_v33 }
 0x98d   :  { %v637_v24 = vsel %vm91_vm2, %v631_v21, 0.0 }
 0x98e   :  { %638 = vadd.xlane.f32.xlu1 %v637_v24 }
 0xa19   :  { %v636_v25 = vpop.xlane.xlu0 %635 }
 0xa1a   :  { %v640_v26 = vmul.f32 0.03125, %v636_v25  ;;  %v1545_v25 = vld [vmem:[%s2531_s2 + $0x18] ss:$0 sm:$0xff] }
 0xa1b   :  { %v639_v27 = vpop.xlane.xlu1 %638 }
 0xa1c   :  { %v642_v28 = vsub.f32 %v628_v32, %v640_v26  ;;  %v641_v29 = vmul.f32 0.03125, %v639_v27 }
 0xa1e   :  { %v643_v30 = vsub.f32 %v631_v21, %v641_v29  ;;  %v644_v31 = vmul.f32 %v642_v28, %v642_v28 }
 0xa20   :  { %v646_v17 = vsel %vm91_vm2, %v644_v31, 0.0  ;;  %v645_v34 = vmul.f32 %v643_v30, %v643_v30 }
 0xa21   :  { %647 = vadd.xlane.f32.xlu0 %v646_v17 }
 0xa22   :  { %v649_v18 = vsel %vm91_vm2, %v645_v34, 0.0 }
 0xa25   :  { %650 = vadd.xlane.f32.xlu0 %v649_v18 }
 0xaae   :  { %v648_v49 = vpop.xlane.xlu0 %647 }
 0xaaf   :  { %v652_v50 = vmul.f32 0.03125, %v648_v49  ;;  %v1551_v49 = vld [vmem:[%s2532_s3 + $0x50] sm:$0xff] }
 0xab1   :  { %v654_v52 = vadd.f32 1e-06, %v652_v50  ;;  %v2307_v50 = vpack.c.bf16 %v1551_v49, %v1549_v48 }
 0xab2   :  { %v651_v53 = vpop.xlane.xlu0 %650 }
 0xab3   :  { %1918 = vrsqrt.f32 %v654_v52  ;;  %v653_v54 = vmul.f32 0.03125, %v651_v53  ;;  %v1553_v52 = vld [vmem:[%s2532_s3 + $0x60] sm:$0xff]  ;;  %v1555_v53 = vld [vmem:[%s2532_s3 + $0x70] sm:$0xff] }
 0xab5   :  { %v655_v55 = vadd.f32 1e-06, %v653_v54  ;;  %v2317_v54 = vpack.c.bf16 %v1555_v53, %v1553_v52 }
 0xab7   :  { %1920 = vrsqrt.f32 %v655_v55 }
 0xabd   :  { %v1919_v57 = vpop.eup %1918 }
 0xabe   :  { %v658_v58 = vmul.f32 %v1919_v57, %v642_v28 }
 0xac0   :  { %v664_v60 = vmul.f32 %v1541_v62, %v658_v58 }
 0xac1   :  { %v1921_v59 = vpop.eup %1920 }
 0xac2   :  { %v659_v63 = vmul.f32 %v1921_v59, %v643_v30  ;;  %v670_v6 = vadd.f32 %v1542_v3, %v664_v60 }
 0xac4   :  { %v665_v5 = vmul.f32 %v1541_v62, %v659_v63 }
 0xac6   :  { %v671_v7 = vadd.f32 %v1542_v3, %v665_v5  ;;  %v1547_v3 = vld [vmem:[%s2531_s2 + $0x19] ss:$0 sm:$0xff] }
 0xac8   :  { %v672_v8 = vpack.c.bf16 %v671_v7, %v670_v6 }
 0xaca   :  { %1708 = vmatmul.mubr.msk.bf16.vlgmr.msra.gmra.mrb[16].mxu1 %vm91_vm2, %v672_v8 }
 0xacb   :  { %1727 = vmatprep.mubr.msk.bf16.mxu1 %vm1967_vm0, %v1966_v0  ;;  %1724 = vmatpush3.bf16.msra.mxu1 %v2307_v50 }
 0xacc   :  { %1725 = vmatprep.subr.bf16.mxu1 %v1966_v0 }
 0xacf   :  { %1726 = vmatpush3.bf16.msra.mxu1 %v2317_v54 }
 0xb9d   :  { %v714_v16 = vpop.f32.mrb[16].mxu1 }
 0xb9e   :  { %v715_v19 = vadd.f32 %v1543_v15, %v714_v16  ;;  %v1709_v32 = vpop.f32.mrb[17].mxu1 }
 0xb9f   :  { %v717_v20 = vpop.f32.mrb[18].mxu1 }
 0xba0   :  { %v718_v37 = vadd.f32 %v1543_v15, %v717_v20  ;;  %v1710_v21 = vpop.f32.mrb[19].mxu1  ;;  %v721_v22 = vmax.f32 %v715_v19, 0.0 }
 0xba2   :  { %v722_v33 = vmax.f32 %v718_v37, 0.0 }
 0xba4   :  { %v723_v24 = vpack.c.bf16 %v722_v33, %v721_v22 }
 0xba6   :  { %1720 = vmatmul.mubr.msk.bf16.vlgmr.msra.gmra.mrb[12].mxu0 %vm368_vm4, %v723_v24 }
 0xc79   :  { %v777_v26 = vpop.f32.mrb[12].mxu0 }
 0xc7a   :  { %v778_v27 = vadd.f32 %v1545_v25, %v777_v26  ;;  %v1721_v28 = vpop.f32.mrb[13].mxu0 }
 0xc7b   :  { %v780_v29 = vpop.f32.mrb[14].mxu0 }
 0xc7c   :  { %v781_v30 = vadd.f32 %v1545_v25, %v780_v29  ;;  %v1722_v31 = vpop.f32.mrb[15].mxu0  ;;  %v784_v17 = vadd.f32 %v778_v27, %v670_v6 }
 0xc7e   :  { %v786_v34 = vsel %vm91_vm2, %v784_v17, 0.0  ;;  %v785_v18 = vadd.f32 %v781_v30, %v671_v7 }
 0xc7f   :  { %787 = vadd.xlane.f32.xlu0 %v786_v34 }
 0xc80   :  { %v789_v35 = vsel %vm91_vm2, %v785_v18, 0.0 }
 0xc81   :  { %790 = vadd.xlane.f32.xlu1 %v789_v35 }
 0xd0c   :  { %v788_v36 = vpop.xlane.xlu0 %787 }
 0xd0d   :  { %v792_v38 = vmul.f32 0.03125, %v788_v36 }
 0xd0e   :  { %v791_v23 = vpop.xlane.xlu1 %790 }
 0xd0f   :  { %v794_v40 = vsub.f32 %v784_v17, %v792_v38  ;;  %v793_v41 = vmul.f32 0.03125, %v791_v23 }
 0xd11   :  { %v795_v42 = vsub.f32 %v785_v18, %v793_v41  ;;  %v796_v43 = vmul.f32 %v794_v40, %v794_v40 }
 0xd13   :  { %v798_v39 = vsel %vm91_vm2, %v796_v43, 0.0  ;;  %v797_v44 = vmul.f32 %v795_v42, %v795_v42 }
 0xd14   :  { %799 = vadd.xlane.f32.xlu0 %v798_v39 }
 0xd15   :  { %v801_v45 = vsel %vm91_vm2, %v797_v44, 0.0 }
 0xd16   :  { %802 = vadd.xlane.f32.xlu1 %v801_v45 }
 0xda1   :  { %v800_v55 = vpop.xlane.xlu0 %799 }
 0xda2   :  { %v804_v57 = vmul.f32 0.03125, %v800_v55 }
 0xda3   :  { %v803_v58 = vpop.xlane.xlu1 %802 }
 0xda4   :  { %v806_v62 = vadd.f32 1e-06, %v804_v57  ;;  %v805_v59 = vmul.f32 0.03125, %v803_v58 }
 0xda6   :  { %1922 = vrsqrt.f32 %v806_v62  ;;  %v807_v60 = vadd.f32 1e-06, %v805_v59 }
 0xda8   :  { %1924 = vrsqrt.f32 %v807_v60 }
 0xdb0   :  { %v1923_v63 = vpop.eup %1922 }
 0xdb1   :  { %v810_v5 = vmul.f32 %v1923_v63, %v794_v40 }
 0xdb2   :  { %v1925_v6 = vpop.eup %1924 }
 0xdb3   :  { %v816_v7 = vmul.f32 %v1547_v3, %v810_v5  ;;  %v811_v8 = vmul.f32 %v1925_v6, %v795_v42 }
 0xdb5   :  { %v817_v11 = vmul.f32 %v1547_v3, %v811_v8  ;;  %v2326_v12 = vadd.f32 %v1548_v9, %v816_v7 }
 0xdb7   :  { %v2328_v13 = vadd.f32 %v1548_v9, %v817_v11 }
 0xdb9   :  { %v843_v2 = vpack.c.bf16 %v2328_v13, %v2326_v12 }
 0xdbb   :  { %1728 = vmatmul.mubr.msk.bf16.vlgmr.msra.gmra.mrb[20].mxu1 %vm91_vm2, %v843_v2 }
 0xe8e   :  { %v881_v14 = vpop.f32.mrb[20].mxu1 }
 0xe8f   :  { %v1729_v15 = vpop.f32.mrb[21].mxu1 }
 0xe90   :  { %v884_v16 = vpop.f32.mrb[22].mxu1 }
 0xe91   :  { %v2333_v19 = vpack.c.bf16 %v884_v16, %v881_v14  ;;  %v1730_v32 = vpop.f32.mrb[23].mxu1  ;;  %v1853_v20 = vpack.i.bf16 %v884_v16, %v881_v14 }
 0xe93   :  { %1854 = vrot.lane.b32.xlu1 %v1853_v20, %s1968_s29  ;;  %1849 = vrot.lane.b32.xlu0 %v1853_v20, %s1969_s30 }
 0xe94   :  { %1739 = vmatprep.mubr.msk.bf16.mxu0 %vm278_vm3, %v2333_v19 }
 0xe97   :  { %1859 = vrot.lane.b32.xlu1 %v1853_v20, %s1970_s8 }
 0xe9b   :  { %916 = vrot.lane.b32.xlu1 %v2333_v19, %s1971_s5 }
 0xf05   :  { %v1855_v37 = vpop.permute.xlu1 %1854  ;;  %v1850_v21 = vpop.permute.xlu0 %1849 }
 0xf06   :  { %v1857_v22 = vunpack.i.h.bf16 %v1855_v37  ;;  %v1856_v33 = vunpack.i.l.bf16 %v1855_v37  ;;  %v1852_v24 = vunpack.i.h.bf16 %v1850_v21  ;;  %v1851_v25 = vunpack.i.l.bf16 %v1850_v21 }
 0xf08   :  { %v2342_v26 = vpack.c.bf16 %v1857_v22, %v1856_v33  ;;  %v2344_v27 = vpack.c.bf16 %v1852_v24, %v1851_v25 }
 0xf09   :  { %v1860_v28 = vpop.permute.xlu1 %1859 }
 0xf0a   :  { %v1862_v29 = vunpack.i.h.bf16 %v1860_v28  ;;  %v1861_v30 = vunpack.i.l.bf16 %v1860_v28  ;;  %918 = vrot.lane.b32.xlu0 %v2344_v27, %s1971_s5  ;;  %920 = vrot.lane.b32.xlu1 %v2342_v26, %s1971_s5 }
 0xf0c   :  { %v2350_v31 = vpack.c.bf16 %v1862_v29, %v1861_v30 }
 0xf0d   :  { %v917_v17 = vpop.permute.xlu1 %916 }
 0xf0e   :  { %v937_v34 = vsel %vm278_vm3, %v917_v17, 0  ;;  %922 = vrot.lane.b32.xlu0 %v2350_v31, %s1971_s5  ;;  %1803 = vmatprep.subr.msk.bf16.mxu0 %vm278_vm3, %v917_v17 }
 0xf0f   :  { %1732 = vmatpush3.bf16.xpose.msra.mxu0 %v937_v34 }
 0xf7c   :  { %v919_v18 = vpop.permute.xlu0 %918  ;;  %v921_v36 = vpop.permute.xlu1 %920 }
 0xf7d   :  { %v940_v35 = vsel %vm278_vm3, %v919_v18, 0  ;;  %1804 = vmatprep.subr.msk.bf16.mxu0 %vm278_vm3, %v919_v18  ;;  %v943_v38 = vsel %vm278_vm3, %v921_v36, 0 }
 0xf7e   :  { %1734 = vmatpush3.bf16.xpose.msra.mxu0 %v940_v35 }
 0xf7f   :  { %1805 = vmatprep.subr.msk.bf16.mxu0 %vm278_vm3, %v921_v36 }
 0xf80   :  { %v923_v23 = vpop.permute.xlu0 %922 }
 0xf81   :  { %v946_v40 = vsel %vm278_vm3, %v923_v23, 0 }
 0xf86   :  { %1736 = vmatpush3.bf16.xpose.msra.mxu0 %v943_v38 }
 0xf87   :  { %1806 = vmatprep.subr.msk.bf16.mxu0 %vm278_vm3, %v923_v23 }
 0xf8e   :  { %1738 = vmatpush3.bf16.xpose.msra.mxu0 %v946_v40 }
 0xf8f   :  { %1779 = vmatprep.subr.bf16.mxu0 %v1966_v0 }
 0xf95   :  { %1740 = vmatmul.mubr.msk.bf16.vlgmr.msra.gmra.mrb[16].mxu0 %vm278_vm3, %v2344_v27 }
 0xf96   :  { %1743 = vmatprep.mubr.msk.bf16.mxu0 %vm278_vm3, %v2342_v26 }
 0xf9d   :  { %1744 = vmatmul.mubr.msk.bf16.gmra.mrb[20].mxu0 %vm278_vm3, %v2350_v31 }
 0xf9e   :  { %1787 = vmatprep.mubr.msk.bf16.mxu0 %vm1967_vm0, %v1966_v0 }
0x1068   :  { %v1741_v41 = vpop.f32.mrb[16].mxu0 }
0x1069   :  { %v991_v42 = vadd.f32 %v1741_v41, %v2132_v46  ;;  %v982_v43 = vpop.f32.mrb[17].mxu0 }
0x106a   :  { %v983_v39 = vadd.f32 %v982_v43, %v2137_v47  ;;  %v1742_v44 = vpop.f32.mrb[18].mxu0 }
0x106b   :  { %v985_v45 = vpop.f32.mrb[19].mxu0  ;;  %v1019_v48 = vsel %vm368_vm4, %v991_v42, -inf  ;;  %v994_v55 = vadd.f32 %v1742_v44, %v2150_v56 }
0x106c   :  { %v986_v49 = vadd.f32 %v985_v45, %v2143_v51  ;;  %1020 = vmax.xlane.f32.xlu0 %v1019_v48  ;;  %v1013_v52 = vsel %vm368_vm4, %v983_v39, -inf }
0x106d   :  { %1014 = vmax.xlane.f32.xlu1 %v1013_v52  ;;  %v1022_v59 = vsel %vm368_vm4, %v994_v55, -inf }
0x106e   :  { %v1016_v53 = vsel %vm368_vm4, %v986_v49, -inf }
0x1070   :  { %v1745_v57 = vpop.f32.mrb[20].mxu0  ;;  %1017 = vmax.xlane.f32.xlu0 %v1016_v53 }
0x1071   :  { %v998_v46 = vpop.f32.mrb[21].mxu0  ;;  %v1007_v60 = vadd.f32 %v1745_v57, %v2164_v1 }
0x1072   :  { %v999_v58 = vadd.f32 %v998_v46, %v2159_v61  ;;  %v1746_v47 = vpop.f32.mrb[22].mxu0 }
0x1073   :  { %v1001_v62 = vpop.f32.mrb[23].mxu0  ;;  %v1010_v56 = vadd.f32 %v1746_v47, %v2177_v10  ;;  %v1031_v5 = vsel %vm368_vm4, %v1007_v60, -inf }
0x1074   :  { %v1002_v51 = vadd.f32 %v1001_v62, %v2169_v4  ;;  %1023 = vmax.xlane.f32.xlu0 %v1022_v59  ;;  %v1025_v63 = vsel %vm368_vm4, %v999_v58, -inf }
0x1075   :  { %1026 = vmax.xlane.f32.xlu1 %v1025_v63  ;;  %v1034_v61 = vsel %vm368_vm4, %v1010_v56, -inf }
0x1076   :  { %v1028_v3 = vsel %vm368_vm4, %v1002_v51, -inf }
0x1078   :  { %1029 = vmax.xlane.f32.xlu0 %v1028_v3 }
0x1079   :  { %1032 = vmax.xlane.f32.xlu1 %v1031_v5 }
0x107c   :  { %1035 = vmax.xlane.f32.xlu0 %v1034_v61 }
0x108a   :  { %1105 = vrot.lane.b32.xlu1 %v2333_v19, %s1972_s24 }
0x10f9   :  { %v1021_v1 = vpop.xlane.xlu0 %1020 }
0x10fa   :  { %v1039_v4 = vsub.f32 %v991_v42, %v1021_v1  ;;  %v1015_v6 = vpop.xlane.xlu1 %1014 }
0x10fb   :  { %v1037_v7 = vsub.f32 %v983_v39, %v1015_v6 }
0x10fc   :  { %v1049_v8 = vmul.f32 1.442695, %v1039_v4 }
0x10fd   :  { %v1045_v9 = vmul.f32 1.442695, %v1037_v7  ;;  %v1018_v11 = vpop.xlane.xlu0 %1017 }
0x10fe   :  { %1926 = vpow2.f32 %v1049_v8  ;;  %v1038_v10 = vsub.f32 %v986_v49, %v1018_v11 }
0x10ff   :  { %1928 = vpow2.f32 %v1045_v9 }
0x1100   :  { %v1047_v16 = vmul.f32 1.442695, %v1038_v10 }
0x1101   :  { %v1024_v2 = vpop.xlane.xlu0 %1023 }
0x1102   :  { %v1040_v14 = vsub.f32 %v994_v55, %v1024_v2  ;;  %v1027_v15 = vpop.xlane.xlu1 %1026 }
0x1103   :  { %v1041_v20 = vsub.f32 %v999_v58, %v1027_v15 }
0x1104   :  { %v1051_v32 = vmul.f32 1.442695, %v1040_v14 }
0x1105   :  { %v1030_v37 = vpop.xlane.xlu0 %1029  ;;  %v1053_v24 = vmul.f32 1.442695, %v1041_v20 }
0x1106   :  { %1930 = vpow2.f32 %v1051_v32  ;;  %v1033_v21 = vpop.xlane.xlu1 %1032  ;;  %v1042_v33 = vsub.f32 %v1002_v51, %v1030_v37 }
0x1107   :  { %v1043_v19 = vsub.f32 %v1007_v60, %v1033_v21  ;;  %1932 = vpow2.f32 %v1047_v16 }
0x1108   :  { %v2389_v22 = vpop.eup %1926  ;;  %v1055_v18 = vmul.f32 1.442695, %v1042_v33 }
0x1109   :  { %v1057_v25 = vmul.f32 1.442695, %v1043_v19  ;;  %v1036_v28 = vpop.xlane.xlu0 %1035  ;;  %v1067_v29 = vsel %vm368_vm4, %v2389_v22, 0.0  ;;  %v1929_v30 = vpop.eup %1928 }
0x110a   :  { %v1044_v17 = vsub.f32 %v1010_v56, %v1036_v28  ;;  %1068 = vadd.xlane.f32.xlu1 %v1067_v29  ;;  %v1106_v34 = vpop.permute.xlu1 %1105  ;;  %v1061_v36 = vsel %vm368_vm4, %v1929_v30, 0.0 }
0x110b   :  { %1934 = vpow2.f32 %v1057_v25  ;;  %1747 = vmatprep.subr.bf16.mxu1 %v1106_v34 }
0x110c   :  { %v1059_v35 = vmul.f32 1.442695, %v1044_v17  ;;  %1748 = vmatpush3.bf16.msra.mxu1 %v1106_v34  ;;  %1936 = vpow2.f32 %v1053_v24 }
0x110e   :  { %1938 = vpow2.f32 %v1059_v35  ;;  %1062 = vadd.xlane.f32.xlu1 %v1061_v36 }
0x110f   :  { %1940 = vpow2.f32 %v1055_v18 }
0x1110   :  { %v1931_v38 = vpop.eup %1930 }
0x1111   :  { %v1070_v23 = vsel %vm368_vm4, %v1931_v38, 0.0  ;;  %v1933_v40 = vpop.eup %1932 }
0x1112   :  { %1071 = vadd.xlane.f32.xlu0 %v1070_v23  ;;  %v1064_v42 = vsel %vm368_vm4, %v1933_v40, 0.0 }
0x1115   :  { %v2395_v41 = vpop.eup %1934 }
0x1116   :  { %1065 = vadd.xlane.f32.xlu0 %v1064_v42  ;;  %v1079_v43 = vsel %vm368_vm4, %v2395_v41, 0.0  ;;  %v1937_v39 = vpop.eup %1936 }
0x1117   :  { %1080 = vadd.xlane.f32.xlu1 %v1079_v43  ;;  %v1073_v49 = vsel %vm368_vm4, %v1937_v39, 0.0 }
0x1118   :  { %v1939_v44 = vpop.eup %1938 }
0x1119   :  { %v1082_v45 = vsel %vm368_vm4, %v1939_v44, 0.0  ;;  %v1941_v48 = vpop.eup %1940 }
0x111a   :  { %1083 = vadd.xlane.f32.xlu0 %v1082_v45  ;;  %v1076_v52 = vsel %vm368_vm4, %v1941_v48, 0.0 }
0x111b   :  { %1074 = vadd.xlane.f32.xlu1 %v1073_v49 }
0x111e   :  { %1077 = vadd.xlane.f32.xlu0 %v1076_v52 }
0x112c   :  { %1109 = vrot.lane.b32.xlu1 %v2342_v26, %s1972_s24 }
0x1130   :  { %1111 = vrot.lane.b32.xlu1 %v2350_v31, %s1972_s24 }
0x1134   :  { %1107 = vrot.lane.b32.xlu0 %v2344_v27, %s1972_s24  ;;  %1227 = vrot.lane.b32.xlu1 %v2307_v50, %s1973_s1 }
0x1197   :  { %v1069_v53 = vpop.xlane.xlu1 %1068 }
0x119b   :  { %v1063_v55 = vpop.xlane.xlu1 %1062 }
0x119c   :  { %1942 = vrcp.f32 %v1063_v55 }
0x119f   :  { %v1072_v57 = vpop.xlane.xlu0 %1071 }
0x11a3   :  { %v1066_v46 = vpop.xlane.xlu0 %1065 }
0x11a4   :  { %1944 = vrcp.f32 %v1066_v46  ;;  %v1081_v58 = vpop.xlane.xlu1 %1080 }
0x11a5   :  { %1946 = vrcp.f32 %v1072_v57 }
0x11a6   :  { %1948 = vrcp.f32 %v1069_v53  ;;  %v1943_v31 = vpop.eup %1942 }
0x11a7   :  { %v1084_v47 = vpop.xlane.xlu0 %1083  ;;  %v1093_v51 = vmul.f32 %v1943_v31, %v1929_v30 }
0x11a8   :  { %v1075_v62 = vpop.xlane.xlu1 %1074 }
0x11a9   :  { %1950 = vrcp.f32 %v1075_v62 }
0x11ab   :  { %v1078_v26 = vpop.xlane.xlu0 %1077 }
0x11ac   :  { %1952 = vrcp.f32 %v1078_v26  ;;  %v1110_v27 = vpop.permute.xlu1 %1109 }
0x11ad   :  { %1954 = vrcp.f32 %v1084_v47 }
0x11ae   :  { %v1945_v59 = vpop.eup %1944  ;;  %1956 = vrcp.f32 %v1081_v58 }
0x11af   :  { %v1108_v60 = vpop.permute.xlu0 %1107  ;;  %v1094_v50 = vmul.f32 %v1945_v59, %v1933_v40  ;;  %v1947_v3 = vpop.eup %1946 }
0x11b0   :  { %1749 = vmatprep.subr.bf16.mxu1 %v1108_v60  ;;  %v1949_v56 = vpop.eup %1948  ;;  %v1112_v61 = vpop.permute.xlu1 %1111  ;;  %v1096_v4 = vmul.f32 %v1947_v3, %v1931_v38  ;;  %v1550_v3 = vld [vmem:[%s2532_s3 + $0x48] sm:$0xff] }
0x11b1   :  { %1750 = vmatpush3.bf16.msra.mxu1 %v1108_v60  ;;  %v1101_v63 = vpack.c.bf16 %v1094_v50, %v1093_v51  ;;  %v1095_v7 = vmul.f32 %v1949_v56, %v2389_v22  ;;  %v1552_v56 = vld [vmem:[%s2532_s3 + $0x58] sm:$0xff] }
0x11b2   :  { %1751 = vmatprep.subr.bf16.mxu1 %v1110_v27 }
0x11b3   :  { %1755 = vmatprep.mubr.msk.bf16.mxu1 %vm368_vm4, %v1101_v63  ;;  %v1951_v5 = vpop.eup %1950  ;;  %v1102_v9 = vpack.c.bf16 %v1096_v4, %v1095_v7  ;;  %v1572_v7 = vld [vmem:[%s2534_s4 + $0x48] sm:$0xff] }
0x11b4   :  { %v1097_v8 = vmul.f32 %v1951_v5, %v1937_v39  ;;  %v1228_v32 = vpop.permute.xlu1 %1227  ;;  %v841_v5 = vpack.c.bf16 %v1552_v56, %v1550_v3 }
0x11b5   :  { %1752 = vmatpush3.bf16.msra.mxu1 %v1110_v27 }
0x11b6   :  { %v1953_v1 = vpop.eup %1952  ;;  %1753 = vmatprep.subr.bf16.mxu1 %v1112_v61 }
0x11b7   :  { %v1098_v6 = vmul.f32 %v1953_v1, %v1941_v48  ;;  %v1955_v11 = vpop.eup %1954  ;;  %v1556_v1 = vld [vmem:[%s2532_s3 + $0x78] sm:$0xff] }
0x11b8   :  { %v1957_v2 = vpop.eup %1956  ;;  %v1100_v14 = vmul.f32 %v1955_v11, %v1939_v44  ;;  %v1574_v11 = vld [vmem:[%s2534_s4 + $0x58] sm:$0xff] }
0x11b9   :  { %1754 = vmatpush3.bf16.msra.mxu1 %v1112_v61  ;;  %v1103_v10 = vpack.c.bf16 %v1098_v6, %v1097_v8  ;;  %v1099_v15 = vmul.f32 %v1957_v2, %v2395_v41  ;;  %v1554_v61 = vld [vmem:[%s2532_s3 + $0x68] sm:$0xff]  ;;  %v1571_v6 = vld [vmem:[%s2534_s4 + $0x40] sm:$0xff]  ;;  %v1573_v8 = vld [vmem:[%s2534_s4 + $0x50] sm:$0xff] }
0x11ba   :  { %1763 = vmatprep.subr.bf16.mxu1 %v1966_v0  ;;  %v842_v4 = vpack.c.bf16 %v1556_v1, %v1554_v61  ;;  %v1469_v61 = vld [vmem:[%s2535_s6] sm:$0xff]  ;;  %v1470_v1 = vld [vmem:[%s2535_s6 + $0x8] sm:$0xff] }
0x11bb   :  { %v1104_v16 = vpack.c.bf16 %v1100_v14, %v1099_v15 }
0x11bc   :  { %1756 = vmatmul.mubr.msk.bf16.vlgmr.msra.gmra.mrb[24].mxu1 %vm368_vm4, %v1102_v9  ;;  %v1376_v9 = vpack.c.bf16 %v1572_v7, %v1571_v6  ;;  %v1471_v6 = vld [vmem:[%s2535_s6 + $0x10] sm:$0xff]  ;;  %v1472_v7 = vld [vmem:[%s2535_s6 + $0x18] sm:$0xff] }
0x11bd   :  { %1759 = vmatprep.mubr.msk.bf16.mxu1 %vm368_vm4, %v1103_v10  ;;  %1764 = vmatpush3.bf16.msra.mxu1 %v1228_v32  ;;  %v1377_v10 = vpack.c.bf16 %v1574_v11, %v1573_v8  ;;  %v1474_v8 = vpack.c.bf16 %v1472_v7, %v1471_v6 }
0x11be   :  { %1765 = vmatprep.subr.bf16.mxu1 %v1966_v0  ;;  %1780 = vmatpush3.bf16.msra.mxu0 %v1376_v9 }
0x11bf   :  { %1781 = vmatprep.subr.bf16.mxu0 %v1966_v0 }
0x11c2   :  { %1782 = vmatpush3.bf16.msra.mxu0 %v1377_v10 }
0x11c3   :  { %1783 = vmatprep.subr.bf16.mxu0 %v1966_v0 }
0x11c4   :  { %1760 = vmatmul.mubr.msk.bf16.gmra.mrb[28].mxu1 %vm368_vm4, %v1104_v16 }
0x11c5   :  { %1767 = vmatprep.mubr.msk.bf16.mxu1 %vm1967_vm0, %v1966_v0 }
0x128f   :  { %v1757_v20 = vpop.f32.mrb[24].mxu1 }
0x1290   :  { %v1163_v37 = vpop.f32.mrb[25].mxu1 }
0x1291   :  { %v1758_v21 = vpop.f32.mrb[26].mxu1 }
0x1292   :  { %v1863_v19 = vpack.i.bf16 %v1758_v21, %v1757_v20  ;;  %v1166_v22 = vpop.f32.mrb[27].mxu1 }
0x1294   :  { %1864 = vrot.lane.b32.xlu0 %v1863_v19, %s1974_s25  ;;  %v1567_v19 = vld [vmem:[%s2531_s2 + $0x1b] ss:$0 sm:$0xff] }
0x1297   :  { %v1761_v33 = vpop.f32.mrb[28].mxu1 }
0x1298   :  { %v1179_v24 = vpop.f32.mrb[29].mxu1 }
0x1299   :  { %v1762_v25 = vpop.f32.mrb[30].mxu1 }
0x129a   :  { %v1868_v28 = vpack.i.bf16 %v1762_v25, %v1761_v33  ;;  %v1182_v29 = vpop.f32.mrb[31].mxu1  ;;  %v1568_v25 = vld [vmem:[%s2531_s2 + $0x1c] ss:$0 sm:$0xff] }
0x129b   :  { %v1873_v30 = vpack.i.bf16 %v1182_v29, %v1179_v24 }
0x129c   :  { %1869 = vrot.lane.b32.xlu0 %v1868_v28, %s1975_s26 }
0x129d   :  { %1874 = vrot.lane.b32.xlu1 %v1873_v30, %s1976_s27 }
0x12a1   :  { %1229 = vrot.lane.b32.xlu1 %v2317_v54, %s1973_s1 }
0x1306   :  { %v1865_v17 = vpop.permute.xlu0 %1864 }
0x1307   :  { %v1867_v34 = vunpack.i.h.bf16 %v1865_v17  ;;  %v1866_v18 = vunpack.i.l.bf16 %v1865_v17 }
0x1309   :  { %v1218_v40 = vsel %vm278_vm3, %v1163_v37, %v1866_v18  ;;  %v1219_v41 = vsel %vm278_vm3, %v1166_v22, %v1867_v34  ;;  %v1575_v34 = vld [vmem:[%s2534_s4 + $0x60] sm:$0xff]  ;;  %v1576_v18 = vld [vmem:[%s2534_s4 + $0x68] sm:$0xff] }
0x130e   :  { %v1870_v35 = vpop.permute.xlu0 %1869 }
0x130f   :  { %v1875_v36 = vpop.permute.xlu1 %1874  ;;  %v1872_v42 = vunpack.i.h.bf16 %v1870_v35  ;;  %v1871_v43 = vunpack.i.l.bf16 %v1870_v35  ;;  %v1378_v35 = vpack.c.bf16 %v1576_v18, %v1575_v34 }
0x1310   :  { %v1877_v38 = vunpack.i.h.bf16 %v1875_v36  ;;  %v1876_v23 = vunpack.i.l.bf16 %v1875_v36  ;;  %v1577_v36 = vld [vmem:[%s2534_s4 + $0x70] sm:$0xff] }
0x1311   :  { %1784 = vmatpush3.bf16.msra.mxu0 %v1378_v35 }
0x1312   :  { %v1221_v39 = vsel %vm44_vm1, %v1219_v41, %v1877_v38  ;;  %v1220_v44 = vsel %vm44_vm1, %v1218_v40, %v1876_v23  ;;  %1785 = vmatprep.subr.bf16.mxu0 %v1966_v0  ;;  %v1578_v38 = vld [vmem:[%s2534_s4 + $0x78] sm:$0xff] }
0x1313   :  { %v1223_v45 = vsel %vm578_vm5, %v1221_v39, %v1872_v42  ;;  %v1222_v54 = vsel %vm578_vm5, %v1220_v44, %v1871_v43  ;;  %v1230_v48 = vpop.permute.xlu1 %1229  ;;  %v1379_v23 = vpack.c.bf16 %v1578_v38, %v1577_v36  ;;  %v1569_v40 = vld [vmem:[%s2531_s2 + $0x1d] ss:$0 sm:$0xff] }
0x1314   :  { %v1224_v49 = vpack.c.bf16 %v1223_v45, %v1222_v54  ;;  %1766 = vmatpush3.bf16.msra.mxu1 %v1230_v48 }
0x1315   :  { %1771 = vmatprep.subr.bf16.mxu1 %v1966_v0  ;;  %1786 = vmatpush3.bf16.msra.mxu0 %v1379_v23 }
0x1317   :  { %1768 = vmatmul.mubr.msk.bf16.vlgmr.msra.gmra.mrb[32].mxu1 %vm91_vm2, %v1224_v49 }
0x1318   :  { %1775 = vmatprep.mubr.msk.bf16.mxu1 %vm1967_vm0, %v1966_v0  ;;  %1772 = vmatpush3.bf16.msra.mxu1 %v841_v5 }
0x1319   :  { %1773 = vmatprep.subr.bf16.mxu1 %v1966_v0 }
0x131c   :  { %1774 = vmatpush3.bf16.msra.mxu1 %v842_v4  ;;  %v1473_v4 = vpack.c.bf16 %v1470_v1, %v1469_v61 }
0x131d   :  { %1791 = vmatprep.subr.bf16.mxu1 %v1966_v0 }
0x13ea   :  { %v1270_v52 = vpop.f32.mrb[32].mxu1 }
0x13eb   :  { %v1271_v53 = vadd.f32 %v1270_v52, %v2326_v12  ;;  %v1769_v55 = vpop.f32.mrb[33].mxu1  ;;  %v1579_v52 = vld [vmem:[%s2531_s2 + $0x1e] ss:$0 sm:$0xff] }
0x13ec   :  { %v1273_v57 = vpop.f32.mrb[34].mxu1 }
0x13ed   :  { %v1274_v46 = vadd.f32 %v1273_v57, %v2328_v13  ;;  %v1770_v58 = vpop.f32.mrb[35].mxu1  ;;  %v1277_v47 = vsel %vm91_vm2, %v1271_v53, 0.0 }
0x13ee   :  { %1278 = vadd.xlane.f32.xlu0 %v1277_v47 }
0x13ef   :  { %v1280_v62 = vsel %vm91_vm2, %v1274_v46, 0.0 }
0x13f0   :  { %1281 = vadd.xlane.f32.xlu1 %v1280_v62 }
0x147b   :  { %v1279_v26 = vpop.xlane.xlu0 %1278 }
0x147c   :  { %v1283_v31 = vmul.f32 0.03125, %v1279_v26 }
0x147d   :  { %v1282_v59 = vpop.xlane.xlu1 %1281 }
0x147e   :  { %v1285_v27 = vsub.f32 %v1271_v53, %v1283_v31  ;;  %v1284_v60 = vmul.f32 0.03125, %v1282_v59 }
0x1480   :  { %v1286_v51 = vsub.f32 %v1274_v46, %v1284_v60  ;;  %v1287_v50 = vmul.f32 %v1285_v27, %v1285_v27 }
0x1482   :  { %v1289_v12 = vsel %vm91_vm2, %v1287_v50, 0.0  ;;  %v1288_v63 = vmul.f32 %v1286_v51, %v1286_v51 }
0x1483   :  { %1290 = vadd.xlane.f32.xlu0 %v1289_v12 }
0x1484   :  { %v1292_v13 = vsel %vm91_vm2, %v1288_v63, 0.0 }
0x1487   :  { %1293 = vadd.xlane.f32.xlu0 %v1292_v13 }
0x1510   :  { %v1291_v2 = vpop.xlane.xlu0 %1290 }
0x1511   :  { %v1295_v14 = vmul.f32 0.03125, %v1291_v2 }
0x1513   :  { %v1297_v15 = vadd.f32 1e-06, %v1295_v14 }
0x1514   :  { %v1294_v16 = vpop.xlane.xlu0 %1293 }
0x1515   :  { %1958 = vrsqrt.f32 %v1297_v15  ;;  %v1296_v32 = vmul.f32 0.03125, %v1294_v16 }
0x1517   :  { %v1298_v20 = vadd.f32 1e-06, %v1296_v32  ;;  %v1581_v32 = vld [vmem:[%s2531_s2 + $0x1f] ss:$0 sm:$0xff] }
0x1519   :  { %1960 = vrsqrt.f32 %v1298_v20 }
0x151f   :  { %v1959_v37 = vpop.eup %1958 }
0x1520   :  { %v1301_v21 = vmul.f32 %v1959_v37, %v1285_v27 }
0x1522   :  { %v1307_v33 = vmul.f32 %v1567_v19, %v1301_v21 }
0x1523   :  { %v1961_v22 = vpop.eup %1960 }
0x1524   :  { %v1302_v24 = vmul.f32 %v1961_v22, %v1286_v51  ;;  %v1313_v29 = vadd.f32 %v1568_v25, %v1307_v33 }
0x1526   :  { %v1308_v28 = vmul.f32 %v1567_v19, %v1302_v24 }
0x1528   :  { %v1314_v30 = vadd.f32 %v1568_v25, %v1308_v28 }
0x152a   :  { %v1315_v17 = vpack.c.bf16 %v1314_v30, %v1313_v29 }
0x152c   :  { %1776 = vmatmul.mubr.msk.bf16.vlgmr.msra.gmra.mrb[36].mxu1 %vm91_vm2, %v1315_v17 }
0x152d   :  { %1795 = vmatprep.mubr.msk.bf16.mxu1 %vm1967_vm0, %v1966_v0  ;;  %1792 = vmatpush3.bf16.msra.mxu1 %v1473_v4 }
0x152e   :  { %1793 = vmatprep.subr.bf16.mxu1 %v1966_v0  ;;  %v1582_v0 = vld [vmem:[%s2531_s2 + $0x20] ss:$0 sm:$0xff] }
0x1531   :  { %1794 = vmatpush3.bf16.msra.mxu1 %v1474_v8 }
0x15ff   :  { %v1357_v41 = vpop.f32.mrb[36].mxu1 }
0x1600   :  { %v1358_v42 = vadd.f32 %v1569_v40, %v1357_v41  ;;  %v1777_v43 = vpop.f32.mrb[37].mxu1 }
0x1601   :  { %v1360_v39 = vpop.f32.mrb[38].mxu1 }
0x1602   :  { %v1361_v44 = vadd.f32 %v1569_v40, %v1360_v39  ;;  %v1778_v45 = vpop.f32.mrb[39].mxu1  ;;  %v1364_v54 = vmax.f32 %v1358_v42, 0.0 }
0x1604   :  { %v1365_v48 = vmax.f32 %v1361_v44, 0.0 }
0x1606   :  { %v1366_v49 = vpack.c.bf16 %v1365_v48, %v1364_v54 }
0x1608   :  { %1788 = vmatmul.mubr.msk.bf16.vlgmr.msra.gmra.mrb[24].mxu0 %vm368_vm4, %v1366_v49 }
0x16db   :  { %v1421_v53 = vpop.f32.mrb[24].mxu0 }
0x16dc   :  { %v1422_v55 = vadd.f32 %v1579_v52, %v1421_v53  ;;  %v1789_v57 = vpop.f32.mrb[25].mxu0 }
0x16dd   :  { %v1424_v46 = vpop.f32.mrb[26].mxu0 }
0x16de   :  { %v1425_v58 = vadd.f32 %v1579_v52, %v1424_v46  ;;  %v1790_v47 = vpop.f32.mrb[27].mxu0  ;;  %v1428_v62 = vadd.f32 %v1422_v55, %v1313_v29 }
0x16e0   :  { %v1430_v26 = vsel %vm91_vm2, %v1428_v62, 0.0  ;;  %v1429_v31 = vadd.f32 %v1425_v58, %v1314_v30 }
0x16e1   :  { %1431 = vadd.xlane.f32.xlu0 %v1430_v26 }
0x16e2   :  { %v1433_v59 = vsel %vm91_vm2, %v1429_v31, 0.0 }
0x16e3   :  { %1434 = vadd.xlane.f32.xlu1 %v1433_v59 }
0x176e   :  { %v1432_v27 = vpop.xlane.xlu0 %1431 }
0x176f   :  { %v1436_v60 = vmul.f32 0.03125, %v1432_v27 }
0x1770   :  { %v1435_v51 = vpop.xlane.xlu1 %1434 }
0x1771   :  { %v1438_v50 = vsub.f32 %v1428_v62, %v1436_v60  ;;  %v1437_v12 = vmul.f32 0.03125, %v1435_v51 }
0x1773   :  { %v1439_v63 = vsub.f32 %v1429_v31, %v1437_v12  ;;  %v1440_v13 = vmul.f32 %v1438_v50, %v1438_v50 }
0x1775   :  { %v1442_v3 = vsel %vm91_vm2, %v1440_v13, 0.0  ;;  %v1441_v56 = vmul.f32 %v1439_v63, %v1439_v63 }
0x1776   :  { %1443 = vadd.xlane.f32.xlu0 %v1442_v3 }
0x1777   :  { %v1445_v5 = vsel %vm91_vm2, %v1441_v56, 0.0 }
0x1778   :  { %1446 = vadd.xlane.f32.xlu1 %v1445_v5 }
0x1803   :  { %v1444_v9 = vpop.xlane.xlu0 %1443 }
0x1804   :  { %v1448_v11 = vmul.f32 0.03125, %v1444_v9 }
0x1805   :  { %v1447_v10 = vpop.xlane.xlu1 %1446 }
0x1806   :  { %v1450_v2 = vadd.f32 1e-06, %v1448_v11  ;;  %v1449_v14 = vmul.f32 0.03125, %v1447_v10 }
0x1808   :  { %1962 = vrsqrt.f32 %v1450_v2  ;;  %v1451_v15 = vadd.f32 1e-06, %v1449_v14 }
0x180a   :  { %1964 = vrsqrt.f32 %v1451_v15 }
0x1812   :  { %v1963_v16 = vpop.eup %1962 }
0x1813   :  { %v1454_v20 = vmul.f32 %v1963_v16, %v1438_v50 }
0x1814   :  { %v1965_v37 = vpop.eup %1964 }
0x1815   :  { %v1460_v21 = vmul.f32 %v1581_v32, %v1454_v20  ;;  %v1455_v19 = vmul.f32 %v1965_v37, %v1439_v63 }
0x1817   :  { %v1461_v22 = vmul.f32 %v1581_v32, %v1455_v19  ;;  %v1466_v33 = vadd.f32 %v1582_v0, %v1460_v21 }
0x1819   :  { %v1467_v24 = vadd.f32 %v1582_v0, %v1461_v22 }
0x181b   :  { %v1468_v25 = vpack.c.bf16 %v1467_v24, %v1466_v33 }
0x181d   :  { %1796 = vmatmul.mubr.msk.bf16.vlgmr.msra.gmra.mrb[40].mxu1 %vm91_vm2, %v1468_v25 }
0x18f0   :  { %v1512_v28 = vpop.f32.mrb[40].mxu1 }
0x18f1   :  { %1519 = vst [vmem:[%s2536_s7] sm:$0xff] %v1512_v28  ;;  %v1797_v29 = vpop.f32.mrb[41].mxu1 }
0x18f2   :  { %v1515_v30 = vpop.f32.mrb[42].mxu1 }
0x18f3   :  { %1520 = vst [vmem:[%s2536_s7 + $0x8] sm:$0xff] %v1515_v30  ;;  %v1798_v17 = vpop.f32.mrb[43].mxu1 }

</bundles_post_ra>
